<compile_context>
chip_gen: v7x
topology: tpu7x:2x2x1
jax: 0.10.0
libtpu: 0.0.40
codegen_flags: <defaults>
</compile_context>

<pallas_src>
import functools
import math

import jax
import jax.numpy as jnp
from jax import lax
from jax.experimental import pallas as pl
from jax.experimental.pallas import tpu as pltpu


def _round_up(x, m):
    return (x + m - 1) // m * m


# ---------------------------------------------------------------------------
# Tiled matmul + bias kernel (bf16 operands, f32 accumulation)
# ---------------------------------------------------------------------------
def _matmul_bias_kernel(x_ref, w_ref, b_ref, o_ref, acc_ref):
    k = pl.program_id(2)

    @pl.when(k == 0)
    def _():
        acc_ref[...] = jnp.zeros_like(acc_ref)

    acc_ref[...] += jnp.dot(x_ref[...], w_ref[...],
                            preferred_element_type=jnp.float32)

    @pl.when(k == pl.num_programs(2) - 1)
    def _():
        o_ref[...] = (acc_ref[...] + b_ref[...]).astype(o_ref.dtype)


def linear_pallas(x2d, w, b, *, out_dtype=jnp.float32, tm=256, tn=256, tk=512):
    """(T, K) @ (K, N) + (1, N): tiled, double-buffered, bf16 MXU, f32 acc."""
    T, K = x2d.shape
    K2, N = w.shape
    assert K == K2
    # Clamp tiles to the (8,128)-rounded axis extent, then pad to tile multiples.
    tm = min(tm, _round_up(T, 8))
    tk = min(tk, _round_up(K, 128))
    tn = min(tn, _round_up(N, 128))
    Tp, Kp, Np = _round_up(T, tm), _round_up(K, tk), _round_up(N, tn)

    xb = x2d.astype(jnp.bfloat16)
    wb = w.astype(jnp.bfloat16)
    bb = b.reshape(1, N).astype(jnp.float32)
    if (Tp, Kp) != (T, K):
        xb = jnp.pad(xb, ((0, Tp - T), (0, Kp - K)))
    if (Kp, Np) != (K, N):
        wb = jnp.pad(wb, ((0, Kp - K), (0, Np - N)))
    if Np != N:
        bb = jnp.pad(bb, ((0, 0), (0, Np - N)))

    grid = (Tp // tm, Np // tn, Kp // tk)
    flops = 2 * Tp * Kp * Np
    bytes_accessed = (2 * (Tp * Kp + Kp * Np) + 4 * Np
                      + Tp * Np * jnp.dtype(out_dtype).itemsize)

    out = pl.pallas_call(
        _matmul_bias_kernel,
        out_shape=jax.ShapeDtypeStruct((Tp, Np), out_dtype),
        grid=grid,
        in_specs=[
            pl.BlockSpec((tm, tk), lambda i, j, k: (i, k)),
            pl.BlockSpec((tk, tn), lambda i, j, k: (k, j)),
            pl.BlockSpec((1, tn), lambda i, j, k: (0, j)),
        ],
        out_specs=pl.BlockSpec((tm, tn), lambda i, j, k: (i, j)),
        scratch_shapes=[pltpu.VMEM((tm, tn), jnp.float32)],
        compiler_params=pltpu.CompilerParams(
            dimension_semantics=("parallel", "parallel", "arbitrary"),
            vmem_limit_bytes=32 * 1024 * 1024),
        cost_estimate=pl.CostEstimate(flops=flops, transcendentals=0,
                                      bytes_accessed=bytes_accessed),
    )(xb, wb, bb)

    if (Tp, Np) != (T, N):
        out = out[:T, :N]
    return out


# ---------------------------------------------------------------------------
# Flash-style attention kernel: grid (B, head_group, q_tile, kv_tile)
# ---------------------------------------------------------------------------
def _flash_attn_kernel(q_ref, k_ref, v_ref, o_ref, m_ref, l_ref, acc_ref, *,
                       heads_per_block, head_dim):
    ki = pl.program_id(3)

    @pl.when(ki == 0)
    def _():
        m_ref[...] = jnp.full(m_ref.shape, -jnp.inf, jnp.float32)
        l_ref[...] = jnp.zeros(l_ref.shape, jnp.float32)
        acc_ref[...] = jnp.zeros(acc_ref.shape, jnp.float32)

    # heads_per_block == 1 whenever head_dim is a multiple of 128 -> no
    # in-kernel lane slicing on production shapes; the loop is a small static
    # unroll only for packed small-head groups.
    for h in range(heads_per_block):
        lo, hi = h * head_dim, (h + 1) * head_dim
        qh = q_ref[0, :, lo:hi]      # (tq, hd)  bf16 (softmax scale pre-folded)
        kh = k_ref[0, :, lo:hi]      # (tkv, hd) bf16
        vh = v_ref[0, :, lo:hi]      # (tkv, hd) bf16

        # q k^T on the MXU contracting last axes (no explicit transpose).
        s = lax.dot_general(qh, kh, (((1,), (1,)), ((), ())),
                            preferred_element_type=jnp.float32)   # (tq, tkv)

        m_prev = m_ref[h]                                          # (tq, 1)
        m_new = jnp.maximum(m_prev, jnp.max(s, axis=-1, keepdims=True))
        alpha = jnp.exp(m_prev - m_new)
        p = jnp.exp(s - m_new)                                     # f32, EUP
        l_ref[h] = alpha * l_ref[h] + jnp.sum(p, axis=-1, keepdims=True)
        acc_ref[h] = alpha * acc_ref[h] + jnp.dot(
            p.astype(vh.dtype), vh, preferred_element_type=jnp.float32)
        m_ref[h] = m_new

    @pl.when(ki == pl.num_programs(3) - 1)
    def _():
        for h in range(heads_per_block):
            lo, hi = h * head_dim, (h + 1) * head_dim
            inv = pl.reciprocal(l_ref[h], approx=True)   # EUP, not VALU divide
            o_ref[0, :, lo:hi] = (acc_ref[h] * inv).astype(o_ref.dtype)


def _seq_tile(S, target):
    """Largest multiple-of-8 divisor of S not exceeding target (or S)."""
    if S <= target:
        return S
    t = (target // 8) * 8
    while t >= 8:
        if S % t == 0:
            return t
        t -= 8
    return S  # TODO(synk): mask/pad ragged KV tiles instead of one full block


def _head_group(num_heads, head_dim):
    """Smallest divisor of H whose lane slab (g*hd) is 128-aligned, else H."""
    for g in range(1, num_heads + 1):
        if num_heads % g == 0 and (g * head_dim) % 128 == 0:
            return g
    return num_heads


def flash_attention(qkv, num_heads, *, block_q=256, block_kv=256,
                    out_dtype=jnp.bfloat16):
    """qkv: (B, S, 3*Dm), scale already folded into q  ->  (B, S, Dm)."""
    B, S, three_dm = qkv.shape
    dm = three_dm // 3
    hd = dm // num_heads
    hpb = _head_group(num_heads, hd)     # heads packed per lane slab
    G = num_heads // hpb                 # head groups = grid axis
    Lb = hpb * hd                        # lane width of one head group
    tq = _seq_tile(S, block_q)
    tkv = _seq_tile(S, block_kv)

    if Lb % 128 == 0:
        # DMA-level head selection straight out of the fused qkv buffer.
        q_arr = k_arr = v_arr = qkv
        qb, kb, vb = 0, G, 2 * G         # lane-block offsets of Q / K / V
    else:
        # Small head_dim: pack all heads (Lb == Dm) and split q/k/v so each
        # lane block equals the full lane extent (keeps BlockSpec legal).
        q_arr = qkv[:, :, :dm]
        k_arr = qkv[:, :, dm:2 * dm]
        v_arr = qkv[:, :, 2 * dm:]
        qb = kb = vb = 0

    grid = (B, G, S // tq, S // tkv)
    flops = 4 * B * num_heads * S * S * hd
    bytes_accessed = 2 * 4 * B * S * dm

    kernel = functools.partial(_flash_attn_kernel,
                               heads_per_block=hpb, head_dim=hd)
    return pl.pallas_call(
        kernel,
        out_shape=jax.ShapeDtypeStruct((B, S, dm), out_dtype),
        grid=grid,
        in_specs=[
            pl.BlockSpec((1, tq, Lb), lambda b, g, qi, ki: (b, qi, qb + g)),
            pl.BlockSpec((1, tkv, Lb), lambda b, g, qi, ki: (b, ki, kb + g)),
            pl.BlockSpec((1, tkv, Lb), lambda b, g, qi, ki: (b, ki, vb + g)),
        ],
        out_specs=pl.BlockSpec((1, tq, Lb), lambda b, g, qi, ki: (b, qi, g)),
        scratch_shapes=[
            pltpu.VMEM((hpb, tq, 1), jnp.float32),    # running max  m
            pltpu.VMEM((hpb, tq, 1), jnp.float32),    # running sum  l
            pltpu.VMEM((hpb, tq, hd), jnp.float32),   # running context acc
        ],
        compiler_params=pltpu.CompilerParams(
            dimension_semantics=("parallel", "parallel", "parallel",
                                 "arbitrary"),
            vmem_limit_bytes=32 * 1024 * 1024),
        cost_estimate=pl.CostEstimate(flops=flops,
                                      transcendentals=B * num_heads * S * S,
                                      bytes_accessed=bytes_accessed),
    )(q_arr, k_arr, v_arr)


# ---------------------------------------------------------------------------
# Parameter fusion (done once at init, off the forward critical path)
# ---------------------------------------------------------------------------
def fuse_mha_params(params, num_heads):
    dm = params["wq"].shape[0]
    scale = 1.0 / math.sqrt(dm // num_heads)   # fold softmax scale into Wq/bq
    w_qkv = jnp.concatenate(
        [params["wq"] * scale, params["wk"], params["wv"]], axis=1)
    b_qkv = jnp.concatenate(
        [params["bq"] * scale, params["bk"], params["bv"]], axis=1)
    return {
        "w_qkv": w_qkv.astype(jnp.bfloat16),
        "b_qkv": b_qkv.astype(jnp.float32),
        "wo": params["wo"].astype(jnp.bfloat16),
        "bo": params["bo"].astype(jnp.float32),
    }


# ---------------------------------------------------------------------------
# Full MHA forward
# ---------------------------------------------------------------------------
def multi_head_attention(x, fused, *, num_heads):
    """x: (B, S, Dm) float32 -> (B, S, Dm) float32."""
    B, S, Dm = x.shape
    assert Dm % num_heads == 0

    # Fused QKV projection: x read from HBM once; bf16 activations out.
    qkv = linear_pallas(x.reshape(B * S, Dm), fused["w_qkv"], fused["b_qkv"],
                        out_dtype=jnp.bfloat16)
    qkv = qkv.reshape(B, S, 3 * Dm)

    # Flash attention (online softmax over KV tiles).
    ctx = flash_attention(qkv, num_heads)                 # (B, S, Dm) bf16

    # Output projection back to f32.
    y = linear_pallas(ctx.reshape(B * S, Dm), fused["wo"], fused["bo"],
                      out_dtype=jnp.float32)
    return y.reshape(B, S, Dm)


# ---------------------------------------------------------------------------
# Pure-JAX f32 reference (for correctness check)
# ---------------------------------------------------------------------------
def mha_reference(x, params, num_heads):
    B, S, Dm = x.shape
    hd = Dm // num_heads
    q = x @ params["wq"] + params["bq"][0]
    k = x @ params["wk"] + params["bk"][0]
    v = x @ params["wv"] + params["bv"][0]

    def split(t):
        return t.reshape(B, S, num_heads, hd).transpose(0, 2, 1, 3)

    qh, kh, vh = split(q), split(k), split(v)
    s = jnp.einsum("bhqd,bhkd->bhqk", qh, kh) / math.sqrt(hd)
    p = jax.nn.softmax(s, axis=-1)
    ctx = jnp.einsum("bhqk,bhkd->bhqd", p, vh)
    ctx = ctx.transpose(0, 2, 1, 3).reshape(B, S, Dm)
    return ctx @ params["wo"] + params["bo"][0]


# ---------------------------------------------------------------------------
# Main
# ---------------------------------------------------------------------------
if __name__ == "__main__":
    B, S, Dm, H = 2, 8, 32, 4

    key = jax.random.PRNGKey(0)
    kx, kq, kk, kv, ko, kbq, kbk, kbv, kbo = jax.random.split(key, 9)

    x = jax.random.normal(kx, (B, S, Dm), dtype=jnp.float32)
    init = lambda k, shape: jax.random.normal(k, shape, dtype=jnp.float32) * 0.05
    params = {
        "wq": init(kq, (Dm, Dm)), "bq": init(kbq, (1, Dm)),
        "wk": init(kk, (Dm, Dm)), "bk": init(kbk, (1, Dm)),
        "wv": init(kv, (Dm, Dm)), "bv": init(kbv, (1, Dm)),
        "wo": init(ko, (Dm, Dm)), "bo": init(kbo, (1, Dm)),
    }

    fused = fuse_mha_params(params, H)    # one-time init-side fusion
    fwd = jax.jit(functools.partial(multi_head_attention, num_heads=H))

    out = jax.block_until_ready(fwd(x, fused))
    ref = mha_reference(x, params, H)

    assert out.shape == (B, S, Dm)
    # Tolerance reflects bf16 GEMM operands (f32 accumulation) and the EUP
    # approximate reciprocal in the softmax normalization.
    assert jnp.allclose(out, ref, atol=2e-2, rtol=2e-2), \
        "Pallas MHA mismatch vs reference"

    print("KERNEL_OK")
</pallas_src>

<mosaic_0001>
module attributes {stable_mosaic.version = 11 : i64} {
  func.func @_matmul_bias_kernel(%arg0: i32, %arg1: i32, %arg2: i32, %arg3: memref<16x128xbf16, #tpu.memory_space<vmem>>, %arg4: memref<128x128xbf16, #tpu.memory_space<vmem>>, %arg5: memref<1x128xf32, #tpu.memory_space<vmem>>, %arg6: memref<16x128xf32, #tpu.memory_space<vmem>>, %arg7: memref<16x128xf32, #tpu.memory_space<vmem>>) attributes {dimension_semantics = [#tpu.dimension_semantics<parallel>, #tpu.dimension_semantics<parallel>, #tpu.dimension_semantics<arbitrary>], iteration_bounds = array<i64: 1, 1, 1>, scalar_prefetch = 0 : i64, scratch_operands = 1 : i64, tpu.core_type = #tpu.core_type<tc>, window_params = [{transform_indices = @transform_0, window_bounds = array<i64: 16, 128>}, {transform_indices = @transform_1, window_bounds = array<i64: 128, 128>}, {transform_indices = @transform_2, window_bounds = array<i64: 1, 128>}, {transform_indices = @transform_3, window_bounds = array<i64: 16, 128>}]} {
    %c0_i32 = arith.constant 0 : i32
    %0 = arith.cmpi eq, %arg2, %c0_i32 : i32
    %1 = arith.extui %0 : i1 to i32
    %c0_i32_0 = arith.constant 0 : i32
    %2 = arith.cmpi ne, %1, %c0_i32_0 : i32
    scf.if %2 {
      %cst_10 = arith.constant 0.000000e+00 : f32
      %12 = vector.broadcast %cst_10 : f32 to vector<16x128xf32>
      %c0_11 = arith.constant 0 : index
      %c0_12 = arith.constant 0 : index
      %13 = vector.load %arg7[%c0_11, %c0_12] : memref<16x128xf32, #tpu.memory_space<vmem>>, vector<16x128xf32>
      tpu.vector_store %arg7[%c0_11, %c0_12], %12 {strides = array<i32>} : memref<16x128xf32, #tpu.memory_space<vmem>>, vector<16x128xf32>,
    } else {
    }
    %c0 = arith.constant 0 : index
    %c0_1 = arith.constant 0 : index
    %3 = vector.load %arg7[%c0, %c0_1] : memref<16x128xf32, #tpu.memory_space<vmem>>, vector<16x128xf32>
    %c0_2 = arith.constant 0 : index
    %c0_3 = arith.constant 0 : index
    %4 = vector.load %arg3[%c0_2, %c0_3] : memref<16x128xbf16, #tpu.memory_space<vmem>>, vector<16x128xbf16>
    %c0_4 = arith.constant 0 : index
    %c0_5 = arith.constant 0 : index
    %5 = vector.load %arg4[%c0_4, %c0_5] : memref<128x128xbf16, #tpu.memory_space<vmem>>, vector<128x128xbf16>
    %cst = arith.constant dense<0.000000e+00> : vector<16x128xf32>
    %6 = tpu.matmul %4, %5, %cst {dimension_numbers = #tpu.dot_dimension_numbers<[1], [0], [0], [1], [0, 0, 1, 1], [], []>} : vector<16x128xbf16>, vector<128x128xbf16>, vector<16x128xf32> -> vector<16x128xf32>
    %7 = arith.addf %3, %6 : vector<16x128xf32>
    %c0_6 = arith.constant 0 : index
    %c0_7 = arith.constant 0 : index
    %8 = vector.load %arg7[%c0_6, %c0_7] : memref<16x128xf32, #tpu.memory_space<vmem>>, vector<16x128xf32>
    tpu.vector_store %arg7[%c0_6, %c0_7], %7 {strides = array<i32>} : memref<16x128xf32, #tpu.memory_space<vmem>>, vector<16x128xf32>,
    %c0_i32_8 = arith.constant 0 : i32
    %9 = arith.cmpi eq, %arg2, %c0_i32_8 : i32
    %10 = arith.extui %9 : i1 to i32
    %c0_i32_9 = arith.constant 0 : i32
    %11 = arith.cmpi ne, %10, %c0_i32_9 : i32
    scf.if %11 {
      %c0_10 = arith.constant 0 : index
      %c0_11 = arith.constant 0 : index
      %12 = vector.load %arg7[%c0_10, %c0_11] : memref<16x128xf32, #tpu.memory_space<vmem>>, vector<16x128xf32>
      %c0_12 = arith.constant 0 : index
      %c0_13 = arith.constant 0 : index
      %13 = vector.load %arg5[%c0_12, %c0_13] : memref<1x128xf32, #tpu.memory_space<vmem>>, vector<1x128xf32>
      %14 = vector.broadcast %13 : vector<1x128xf32> to vector<16x128xf32>
      %15 = arith.addf %12, %14 : vector<16x128xf32>
      %c0_14 = arith.constant 0 : index
      %c0_15 = arith.constant 0 : index
      %16 = vector.load %arg6[%c0_14, %c0_15] : memref<16x128xf32, #tpu.memory_space<vmem>>, vector<16x128xf32>
      tpu.vector_store %arg6[%c0_14, %c0_15], %15 {strides = array<i32>} : memref<16x128xf32, #tpu.memory_space<vmem>>, vector<16x128xf32>,
    } else {
    }
    return
  }
  func.func @transform_0(%arg0: i32, %arg1: i32, %arg2: i32) -> (i32, i32) {
    %c0_i32 = arith.constant 0 : i32
    return %arg0, %arg2 : i32, i32
  }
  func.func @transform_1(%arg0: i32, %arg1: i32, %arg2: i32) -> (i32, i32) {
    %c0_i32 = arith.constant 0 : i32
    return %arg2, %arg1 : i32, i32
  }
  func.func @transform_2(%arg0: i32, %arg1: i32, %arg2: i32) -> (i32, i32) {
    %c0_i32 = arith.constant 0 : i32
    %c0_i32_0 = arith.constant 0 : i32
    return %c0_i32, %arg1 : i32, i32
  }
  func.func @transform_3(%arg0: i32, %arg1: i32, %arg2: i32) -> (i32, i32) {
    %c0_i32 = arith.constant 0 : i32
    return %arg0, %arg1 : i32, i32
  }
}

module attributes {stable_mosaic.version = 11 : i64} {
  func.func @_matmul_bias_kernel(%arg0: i32, %arg1: i32, %arg2: i32, %arg3: memref<16x128xbf16, #tpu.memory_space<vmem>>, %arg4: memref<128x128xbf16, #tpu.memory_space<vmem>>, %arg5: memref<1x128xf32, #tpu.memory_space<vmem>>, %arg6: memref<16x128xbf16, #tpu.memory_space<vmem>>, %arg7: memref<16x128xf32, #tpu.memory_space<vmem>>) attributes {dimension_semantics = [#tpu.dimension_semantics<parallel>, #tpu.dimension_semantics<parallel>, #tpu.dimension_semantics<arbitrary>], iteration_bounds = array<i64: 1, 1, 1>, scalar_prefetch = 0 : i64, scratch_operands = 1 : i64, tpu.core_type = #tpu.core_type<tc>, window_params = [{transform_indices = @transform_0, window_bounds = array<i64: 16, 128>}, {transform_indices = @transform_1, window_bounds = array<i64: 128, 128>}, {transform_indices = @transform_2, window_bounds = array<i64: 1, 128>}, {transform_indices = @transform_3, window_bounds = array<i64: 16, 128>}]} {
    %c0_i32 = arith.constant 0 : i32
    %0 = arith.cmpi eq, %arg2, %c0_i32 : i32
    %1 = arith.extui %0 : i1 to i32
    %c0_i32_0 = arith.constant 0 : i32
    %2 = arith.cmpi ne, %1, %c0_i32_0 : i32
    scf.if %2 {
      %cst_10 = arith.constant 0.000000e+00 : f32
      %12 = vector.broadcast %cst_10 : f32 to vector<16x128xf32>
      %c0_11 = arith.constant 0 : index
      %c0_12 = arith.constant 0 : index
      %13 = vector.load %arg7[%c0_11, %c0_12] : memref<16x128xf32, #tpu.memory_space<vmem>>, vector<16x128xf32>
      tpu.vector_store %arg7[%c0_11, %c0_12], %12 {strides = array<i32>} : memref<16x128xf32, #tpu.memory_space<vmem>>, vector<16x128xf32>,
    } else {
    }
    %c0 = arith.constant 0 : index
    %c0_1 = arith.constant 0 : index
    %3 = vector.load %arg7[%c0, %c0_1] : memref<16x128xf32, #tpu.memory_space<vmem>>, vector<16x128xf32>
    %c0_2 = arith.constant 0 : index
    %c0_3 = arith.constant 0 : index
    %4 = vector.load %arg3[%c0_2, %c0_3] : memref<16x128xbf16, #tpu.memory_space<vmem>>, vector<16x128xbf16>
    %c0_4 = arith.constant 0 : index
    %c0_5 = arith.constant 0 : index
    %5 = vector.load %arg4[%c0_4, %c0_5] : memref<128x128xbf16, #tpu.memory_space<vmem>>, vector<128x128xbf16>
    %cst = arith.constant dense<0.000000e+00> : vector<16x128xf32>
    %6 = tpu.matmul %4, %5, %cst {dimension_numbers = #tpu.dot_dimension_numbers<[1], [0], [0], [1], [0, 0, 1, 1], [], []>} : vector<16x128xbf16>, vector<128x128xbf16>, vector<16x128xf32> -> vector<16x128xf32>
    %7 = arith.addf %3, %6 : vector<16x128xf32>
    %c0_6 = arith.constant 0 : index
    %c0_7 = arith.constant 0 : index
    %8 = vector.load %arg7[%c0_6, %c0_7] : memref<16x128xf32, #tpu.memory_space<vmem>>, vector<16x128xf32>
    tpu.vector_store %arg7[%c0_6, %c0_7], %7 {strides = array<i32>} : memref<16x128xf32, #tpu.memory_space<vmem>>, vector<16x128xf32>,
    %c0_i32_8 = arith.constant 0 : i32
    %9 = arith.cmpi eq, %arg2, %c0_i32_8 : i32
    %10 = arith.extui %9 : i1 to i32
    %c0_i32_9 = arith.constant 0 : i32
    %11 = arith.cmpi ne, %10, %c0_i32_9 : i32
    scf.if %11 {
      %c0_10 = arith.constant 0 : index
      %c0_11 = arith.constant 0 : index
      %12 = vector.load %arg7[%c0_10, %c0_11] : memref<16x128xf32, #tpu.memory_space<vmem>>, vector<16x128xf32>
      %c0_12 = arith.constant 0 : index
      %c0_13 = arith.constant 0 : index
      %13 = vector.load %arg5[%c0_12, %c0_13] : memref<1x128xf32, #tpu.memory_space<vmem>>, vector<1x128xf32>
      %14 = vector.broadcast %13 : vector<1x128xf32> to vector<16x128xf32>
      %15 = arith.addf %12, %14 : vector<16x128xf32>
      %16 = arith.truncf %15 : vector<16x128xf32> to vector<16x128xbf16>
      %c0_14 = arith.constant 0 : index
      %c0_15 = arith.constant 0 : index
      %17 = vector.load %arg6[%c0_14, %c0_15] : memref<16x128xbf16, #tpu.memory_space<vmem>>, vector<16x128xbf16>
      tpu.vector_store %arg6[%c0_14, %c0_15], %16 {strides = array<i32>} : memref<16x128xbf16, #tpu.memory_space<vmem>>, vector<16x128xbf16>,
    } else {
    }
    return
  }
  func.func @transform_0(%arg0: i32, %arg1: i32, %arg2: i32) -> (i32, i32) {
    %c0_i32 = arith.constant 0 : i32
    return %arg0, %arg2 : i32, i32
  }
  func.func @transform_1(%arg0: i32, %arg1: i32, %arg2: i32) -> (i32, i32) {
    %c0_i32 = arith.constant 0 : i32
    return %arg2, %arg1 : i32, i32
  }
  func.func @transform_2(%arg0: i32, %arg1: i32, %arg2: i32) -> (i32, i32) {
    %c0_i32 = arith.constant 0 : i32
    %c0_i32_0 = arith.constant 0 : i32
    return %c0_i32, %arg1 : i32, i32
  }
  func.func @transform_3(%arg0: i32, %arg1: i32, %arg2: i32) -> (i32, i32) {
    %c0_i32 = arith.constant 0 : i32
    return %arg0, %arg1 : i32, i32
  }
}

module attributes {stable_mosaic.version = 11 : i64} {
  func.func @_flash_attn_kernel(%arg0: i32, %arg1: i32, %arg2: i32, %arg3: i32, %arg4: memref<1x8x32xbf16, #tpu.memory_space<vmem>>, %arg5: memref<1x8x32xbf16, #tpu.memory_space<vmem>>, %arg6: memref<1x8x32xbf16, #tpu.memory_space<vmem>>, %arg7: memref<1x8x32xbf16, #tpu.memory_space<vmem>>, %arg8: memref<4x8x1xf32, #tpu.memory_space<vmem>>, %arg9: memref<4x8x1xf32, #tpu.memory_space<vmem>>, %arg10: memref<4x8x8xf32, #tpu.memory_space<vmem>>) attributes {dimension_semantics = [#tpu.dimension_semantics<parallel>, #tpu.dimension_semantics<parallel>, #tpu.dimension_semantics<parallel>, #tpu.dimension_semantics<arbitrary>], iteration_bounds = array<i64: 2, 1, 1, 1>, scalar_prefetch = 0 : i64, scratch_operands = 3 : i64, tpu.core_type = #tpu.core_type<tc>, window_params = [{transform_indices = @transform_0, window_bounds = array<i64: 1, 8, 32>}, {transform_indices = @transform_1, window_bounds = array<i64: 1, 8, 32>}, {transform_indices = @transform_2, window_bounds = array<i64: 1, 8, 32>}, {transform_indices = @transform_3, window_bounds = array<i64: 1, 8, 32>}]} {
    %c0_i32 = arith.constant 0 : i32
    %0 = arith.cmpi eq, %arg3, %c0_i32 : i32
    %1 = arith.extui %0 : i1 to i32
    %c0_i32_0 = arith.constant 0 : i32
    %2 = arith.cmpi ne, %1, %c0_i32_0 : i32
    scf.if %2 {
      %cst_119 = arith.constant 0xFF800000 : f32
      %162 = vector.broadcast %cst_119 : f32 to vector<4x8x1xf32>
      %c0_120 = arith.constant 0 : index
      %c0_121 = arith.constant 0 : index
      %c0_122 = arith.constant 0 : index
      %163 = vector.load %arg8[%c0_120, %c0_121, %c0_122] : memref<4x8x1xf32, #tpu.memory_space<vmem>>, vector<4x8x1xf32>
      tpu.vector_store %arg8[%c0_120, %c0_121, %c0_122], %162 {strides = array<i32>} : memref<4x8x1xf32, #tpu.memory_space<vmem>>, vector<4x8x1xf32>,
      %cst_123 = arith.constant 0.000000e+00 : f32
      %164 = vector.broadcast %cst_123 : f32 to vector<4x8x1xf32>
      %c0_124 = arith.constant 0 : index
      %c0_125 = arith.constant 0 : index
      %c0_126 = arith.constant 0 : index
      %165 = vector.load %arg9[%c0_124, %c0_125, %c0_126] : memref<4x8x1xf32, #tpu.memory_space<vmem>>, vector<4x8x1xf32>
      tpu.vector_store %arg9[%c0_124, %c0_125, %c0_126], %164 {strides = array<i32>} : memref<4x8x1xf32, #tpu.memory_space<vmem>>, vector<4x8x1xf32>,
      %cst_127 = arith.constant 0.000000e+00 : f32
      %166 = vector.broadcast %cst_127 : f32 to vector<4x8x8xf32>
      %c0_128 = arith.constant 0 : index
      %c0_129 = arith.constant 0 : index
      %c0_130 = arith.constant 0 : index
      %167 = vector.load %arg10[%c0_128, %c0_129, %c0_130] : memref<4x8x8xf32, #tpu.memory_space<vmem>>, vector<4x8x8xf32>
      tpu.vector_store %arg10[%c0_128, %c0_129, %c0_130], %166 {strides = array<i32>} : memref<4x8x8xf32, #tpu.memory_space<vmem>>, vector<4x8x8xf32>,
    } else {
    }
    %c0 = arith.constant 0 : index
    %c0_1 = arith.constant 0 : index
    %c0_2 = arith.constant 0 : index
    %3 = vector.load %arg4[%c0, %c0_1, %c0_2] : memref<1x8x32xbf16, #tpu.memory_space<vmem>>, vector<1x8x8xbf16>
    %4 = vector.shape_cast %3 : vector<1x8x8xbf16> to vector<8x8xbf16>
    %c0_3 = arith.constant 0 : index
    %c0_4 = arith.constant 0 : index
    %c0_5 = arith.constant 0 : index
    %5 = vector.load %arg5[%c0_3, %c0_4, %c0_5] : memref<1x8x32xbf16, #tpu.memory_space<vmem>>, vector<1x8x8xbf16>
    %6 = vector.shape_cast %5 : vector<1x8x8xbf16> to vector<8x8xbf16>
    %c0_6 = arith.constant 0 : index
    %c0_7 = arith.constant 0 : index
    %c0_8 = arith.constant 0 : index
    %7 = vector.load %arg6[%c0_6, %c0_7, %c0_8] : memref<1x8x32xbf16, #tpu.memory_space<vmem>>, vector<1x8x8xbf16>
    %8 = vector.shape_cast %7 : vector<1x8x8xbf16> to vector<8x8xbf16>
    %cst = arith.constant dense<0.000000e+00> : vector<8x8xf32>
    %9 = tpu.matmul %4, %6, %cst {dimension_numbers = #tpu.dot_dimension_numbers<[1], [1], [0], [0], [0, 0, 1, 0], [], []>} : vector<8x8xbf16>, vector<8x8xbf16>, vector<8x8xf32> -> vector<8x8xf32>
    %c0_9 = arith.constant 0 : index
    %c0_10 = arith.constant 0 : index
    %c0_11 = arith.constant 0 : index
    %10 = vector.load %arg8[%c0_9, %c0_10, %c0_11] : memref<4x8x1xf32, #tpu.memory_space<vmem>>, vector<1x8x1xf32>
    %11 = vector.shape_cast %10 : vector<1x8x1xf32> to vector<8x1xf32>
    %cst_12 = arith.constant dense<0xFF800000> : vector<8xf32>
    %12 = vector.multi_reduction <maximumf>, %9, %cst_12 [1] : vector<8x8xf32> to vector<8xf32>
    %13 = vector.shape_cast %12 : vector<8xf32> to vector<8x1xf32>
    %14 = arith.maximumf %11, %13 : vector<8x1xf32>
    %15 = arith.subf %11, %14 : vector<8x1xf32>
    %16 = math.exp %15 : vector<8x1xf32>
    %17 = vector.broadcast %14 : vector<8x1xf32> to vector<8x8xf32>
    %18 = arith.subf %9, %17 : vector<8x8xf32>
    %19 = math.exp %18 : vector<8x8xf32>
    %c0_13 = arith.constant 0 : index
    %c0_14 = arith.constant 0 : index
    %c0_15 = arith.constant 0 : index
    %20 = vector.load %arg9[%c0_13, %c0_14, %c0_15] : memref<4x8x1xf32, #tpu.memory_space<vmem>>, vector<1x8x1xf32>
    %21 = vector.shape_cast %20 : vector<1x8x1xf32> to vector<8x1xf32>
    %22 = arith.mulf %16, %21 : vector<8x1xf32>
    %cst_16 = arith.constant dense<0.000000e+00> : vector<8xf32>
    %23 = vector.multi_reduction <add>, %19, %cst_16 [1] : vector<8x8xf32> to vector<8xf32>
    %24 = vector.shape_cast %23 : vector<8xf32> to vector<8x1xf32>
    %25 = arith.addf %22, %24 : vector<8x1xf32>
    %c0_17 = arith.constant 0 : index
    %c0_18 = arith.constant 0 : index
    %c0_19 = arith.constant 0 : index
    %26 = vector.load %arg9[%c0_17, %c0_18, %c0_19] : memref<4x8x1xf32, #tpu.memory_space<vmem>>, vector<1x8x1xf32>
    %27 = vector.shape_cast %26 : vector<1x8x1xf32> to vector<8x1xf32>
    %28 = vector.shape_cast %25 : vector<8x1xf32> to vector<1x8x1xf32>
    tpu.vector_store %arg9[%c0_17, %c0_18, %c0_19], %28 {strides = array<i32>} : memref<4x8x1xf32, #tpu.memory_space<vmem>>, vector<1x8x1xf32>,
    %c0_20 = arith.constant 0 : index
    %c0_21 = arith.constant 0 : index
    %c0_22 = arith.constant 0 : index
    %29 = vector.load %arg10[%c0_20, %c0_21, %c0_22] : memref<4x8x8xf32, #tpu.memory_space<vmem>>, vector<1x8x8xf32>
    %30 = vector.shape_cast %29 : vector<1x8x8xf32> to vector<8x8xf32>
    %31 = vector.broadcast %16 : vector<8x1xf32> to vector<8x8xf32>
    %32 = arith.mulf %31, %30 : vector<8x8xf32>
    %33 = arith.truncf %19 : vector<8x8xf32> to vector<8x8xbf16>
    %cst_23 = arith.constant dense<0.000000e+00> : vector<8x8xf32>
    %34 = tpu.matmul %33, %8, %cst_23 {dimension_numbers = #tpu.dot_dimension_numbers<[1], [0], [0], [1], [0, 0, 1, 1], [], []>} : vector<8x8xbf16>, vector<8x8xbf16>, vector<8x8xf32> -> vector<8x8xf32>
    %35 = arith.addf %32, %34 : vector<8x8xf32>
    %c0_24 = arith.constant 0 : index
    %c0_25 = arith.constant 0 : index
    %c0_26 = arith.constant 0 : index
    %36 = vector.load %arg10[%c0_24, %c0_25, %c0_26] : memref<4x8x8xf32, #tpu.memory_space<vmem>>, vector<1x8x8xf32>
    %37 = vector.shape_cast %36 : vector<1x8x8xf32> to vector<8x8xf32>
    %38 = vector.shape_cast %35 : vector<8x8xf32> to vector<1x8x8xf32>
    tpu.vector_store %arg10[%c0_24, %c0_25, %c0_26], %38 {strides = array<i32>} : memref<4x8x8xf32, #tpu.memory_space<vmem>>, vector<1x8x8xf32>,
    %c0_27 = arith.constant 0 : index
    %c0_28 = arith.constant 0 : index
    %c0_29 = arith.constant 0 : index
    %39 = vector.load %arg8[%c0_27, %c0_28, %c0_29] : memref<4x8x1xf32, #tpu.memory_space<vmem>>, vector<1x8x1xf32>
    %40 = vector.shape_cast %39 : vector<1x8x1xf32> to vector<8x1xf32>
    %41 = vector.shape_cast %14 : vector<8x1xf32> to vector<1x8x1xf32>
    tpu.vector_store %arg8[%c0_27, %c0_28, %c0_29], %41 {strides = array<i32>} : memref<4x8x1xf32, #tpu.memory_space<vmem>>, vector<1x8x1xf32>,
    %c0_30 = arith.constant 0 : index
    %c0_31 = arith.constant 0 : index
    %c8 = arith.constant 8 : index
    %42 = vector.load %arg4[%c0_30, %c0_31, %c8] : memref<1x8x32xbf16, #tpu.memory_space<vmem>>, vector<1x8x8xbf16>
    %43 = vector.shape_cast %42 : vector<1x8x8xbf16> to vector<8x8xbf16>
    %c0_32 = arith.constant 0 : index
    %c0_33 = arith.constant 0 : index
    %c8_34 = arith.constant 8 : index
    %44 = vector.load %arg5[%c0_32, %c0_33, %c8_34] : memref<1x8x32xbf16, #tpu.memory_space<vmem>>, vector<1x8x8xbf16>
    %45 = vector.shape_cast %44 : vector<1x8x8xbf16> to vector<8x8xbf16>
    %c0_35 = arith.constant 0 : index
    %c0_36 = arith.constant 0 : index
    %c8_37 = arith.constant 8 : index
    %46 = vector.load %arg6[%c0_35, %c0_36, %c8_37] : memref<1x8x32xbf16, #tpu.memory_space<vmem>>, vector<1x8x8xbf16>
    %47 = vector.shape_cast %46 : vector<1x8x8xbf16> to vector<8x8xbf16>
    %cst_38 = arith.constant dense<0.000000e+00> : vector<8x8xf32>
    %48 = tpu.matmul %43, %45, %cst_38 {dimension_numbers = #tpu.dot_dimension_numbers<[1], [1], [0], [0], [0, 0, 1, 0], [], []>} : vector<8x8xbf16>, vector<8x8xbf16>, vector<8x8xf32> -> vector<8x8xf32>
    %c1 = arith.constant 1 : index
    %c0_39 = arith.constant 0 : index
    %c0_40 = arith.constant 0 : index
    %49 = vector.load %arg8[%c1, %c0_39, %c0_40] : memref<4x8x1xf32, #tpu.memory_space<vmem>>, vector<1x8x1xf32>
    %50 = vector.shape_cast %49 : vector<1x8x1xf32> to vector<8x1xf32>
    %cst_41 = arith.constant dense<0xFF800000> : vector<8xf32>
    %51 = vector.multi_reduction <maximumf>, %48, %cst_41 [1] : vector<8x8xf32> to vector<8xf32>
    %52 = vector.shape_cast %51 : vector<8xf32> to vector<8x1xf32>
    %53 = arith.maximumf %50, %52 : vector<8x1xf32>
    %54 = arith.subf %50, %53 : vector<8x1xf32>
    %55 = math.exp %54 : vector<8x1xf32>
    %56 = vector.broadcast %53 : vector<8x1xf32> to vector<8x8xf32>
    %57 = arith.subf %48, %56 : vector<8x8xf32>
    %58 = math.exp %57 : vector<8x8xf32>
    %c1_42 = arith.constant 1 : index
    %c0_43 = arith.constant 0 : index
    %c0_44 = arith.constant 0 : index
    %59 = vector.load %arg9[%c1_42, %c0_43, %c0_44] : memref<4x8x1xf32, #tpu.memory_space<vmem>>, vector<1x8x1xf32>
    %60 = vector.shape_cast %59 : vector<1x8x1xf32> to vector<8x1xf32>
    %61 = arith.mulf %55, %60 : vector<8x1xf32>
    %cst_45 = arith.constant dense<0.000000e+00> : vector<8xf32>
    %62 = vector.multi_reduction <add>, %58, %cst_45 [1] : vector<8x8xf32> to vector<8xf32>
    %63 = vector.shape_cast %62 : vector<8xf32> to vector<8x1xf32>
    %64 = arith.addf %61, %63 : vector<8x1xf32>
    %c1_46 = arith.constant 1 : index
    %c0_47 = arith.constant 0 : index
    %c0_48 = arith.constant 0 : index
    %65 = vector.load %arg9[%c1_46, %c0_47, %c0_48] : memref<4x8x1xf32, #tpu.memory_space<vmem>>, vector<1x8x1xf32>
    %66 = vector.shape_cast %65 : vector<1x8x1xf32> to vector<8x1xf32>
    %67 = vector.shape_cast %64 : vector<8x1xf32> to vector<1x8x1xf32>
    tpu.vector_store %arg9[%c1_46, %c0_47, %c0_48], %67 {strides = array<i32>} : memref<4x8x1xf32, #tpu.memory_space<vmem>>, vector<1x8x1xf32>,
    %c1_49 = arith.constant 1 : index
    %c0_50 = arith.constant 0 : index
    %c0_51 = arith.constant 0 : index
    %68 = vector.load %arg10[%c1_49, %c0_50, %c0_51] : memref<4x8x8xf32, #tpu.memory_space<vmem>>, vector<1x8x8xf32>
    %69 = vector.shape_cast %68 : vector<1x8x8xf32> to vector<8x8xf32>
    %70 = vector.broadcast %55 : vector<8x1xf32> to vector<8x8xf32>
    %71 = arith.mulf %70, %69 : vector<8x8xf32>
    %72 = arith.truncf %58 : vector<8x8xf32> to vector<8x8xbf16>
    %cst_52 = arith.constant dense<0.000000e+00> : vector<8x8xf32>
    %73 = tpu.matmul %72, %47, %cst_52 {dimension_numbers = #tpu.dot_dimension_numbers<[1], [0], [0], [1], [0, 0, 1, 1], [], []>} : vector<8x8xbf16>, vector<8x8xbf16>, vector<8x8xf32> -> vector<8x8xf32>
    %74 = arith.addf %71, %73 : vector<8x8xf32>
    %c1_53 = arith.constant 1 : index
    %c0_54 = arith.constant 0 : index
    %c0_55 = arith.constant 0 : index
    %75 = vector.load %arg10[%c1_53, %c0_54, %c0_55] : memref<4x8x8xf32, #tpu.memory_space<vmem>>, vector<1x8x8xf32>
    %76 = vector.shape_cast %75 : vector<1x8x8xf32> to vector<8x8xf32>
    %77 = vector.shape_cast %74 : vector<8x8xf32> to vector<1x8x8xf32>
    tpu.vector_store %arg10[%c1_53, %c0_54, %c0_55], %77 {strides = array<i32>} : memref<4x8x8xf32, #tpu.memory_space<vmem>>, vector<1x8x8xf32>,
    %c1_56 = arith.constant 1 : index
    %c0_57 = arith.constant 0 : index
    %c0_58 = arith.constant 0 : index
    %78 = vector.load %arg8[%c1_56, %c0_57, %c0_58] : memref<4x8x1xf32, #tpu.memory_space<vmem>>, vector<1x8x1xf32>
    %79 = vector.shape_cast %78 : vector<1x8x1xf32> to vector<8x1xf32>
    %80 = vector.shape_cast %53 : vector<8x1xf32> to vector<1x8x1xf32>
    tpu.vector_store %arg8[%c1_56, %c0_57, %c0_58], %80 {strides = array<i32>} : memref<4x8x1xf32, #tpu.memory_space<vmem>>, vector<1x8x1xf32>,
    %c0_59 = arith.constant 0 : index
    %c0_60 = arith.constant 0 : index
    %c16 = arith.constant 16 : index
    %81 = vector.load %arg4[%c0_59, %c0_60, %c16] : memref<1x8x32xbf16, #tpu.memory_space<vmem>>, vector<1x8x8xbf16>
    %82 = vector.shape_cast %81 : vector<1x8x8xbf16> to vector<8x8xbf16>
    %c0_61 = arith.constant 0 : index
    %c0_62 = arith.constant 0 : index
    %c16_63 = arith.constant 16 : index
    %83 = vector.load %arg5[%c0_61, %c0_62, %c16_63] : memref<1x8x32xbf16, #tpu.memory_space<vmem>>, vector<1x8x8xbf16>
    %84 = vector.shape_cast %83 : vector<1x8x8xbf16> to vector<8x8xbf16>
    %c0_64 = arith.constant 0 : index
    %c0_65 = arith.constant 0 : index
    %c16_66 = arith.constant 16 : index
    %85 = vector.load %arg6[%c0_64, %c0_65, %c16_66] : memref<1x8x32xbf16, #tpu.memory_space<vmem>>, vector<1x8x8xbf16>
    %86 = vector.shape_cast %85 : vector<1x8x8xbf16> to vector<8x8xbf16>
    %cst_67 = arith.constant dense<0.000000e+00> : vector<8x8xf32>
    %87 = tpu.matmul %82, %84, %cst_67 {dimension_numbers = #tpu.dot_dimension_numbers<[1], [1], [0], [0], [0, 0, 1, 0], [], []>} : vector<8x8xbf16>, vector<8x8xbf16>, vector<8x8xf32> -> vector<8x8xf32>
    %c2 = arith.constant 2 : index
    %c0_68 = arith.constant 0 : index
    %c0_69 = arith.constant 0 : index
    %88 = vector.load %arg8[%c2, %c0_68, %c0_69] : memref<4x8x1xf32, #tpu.memory_space<vmem>>, vector<1x8x1xf32>
    %89 = vector.shape_cast %88 : vector<1x8x1xf32> to vector<8x1xf32>
    %cst_70 = arith.constant dense<0xFF800000> : vector<8xf32>
    %90 = vector.multi_reduction <maximumf>, %87, %cst_70 [1] : vector<8x8xf32> to vector<8xf32>
    %91 = vector.shape_cast %90 : vector<8xf32> to vector<8x1xf32>
    %92 = arith.maximumf %89, %91 : vector<8x1xf32>
    %93 = arith.subf %89, %92 : vector<8x1xf32>
    %94 = math.exp %93 : vector<8x1xf32>
    %95 = vector.broadcast %92 : vector<8x1xf32> to vector<8x8xf32>
    %96 = arith.subf %87, %95 : vector<8x8xf32>
    %97 = math.exp %96 : vector<8x8xf32>
    %c2_71 = arith.constant 2 : index
    %c0_72 = arith.constant 0 : index
    %c0_73 = arith.constant 0 : index
    %98 = vector.load %arg9[%c2_71, %c0_72, %c0_73] : memref<4x8x1xf32, #tpu.memory_space<vmem>>, vector<1x8x1xf32>
    %99 = vector.shape_cast %98 : vector<1x8x1xf32> to vector<8x1xf32>
    %100 = arith.mulf %94, %99 : vector<8x1xf32>
    %cst_74 = arith.constant dense<0.000000e+00> : vector<8xf32>
    %101 = vector.multi_reduction <add>, %97, %cst_74 [1] : vector<8x8xf32> to vector<8xf32>
    %102 = vector.shape_cast %101 : vector<8xf32> to vector<8x1xf32>
    %103 = arith.addf %100, %102 : vector<8x1xf32>
    %c2_75 = arith.constant 2 : index
    %c0_76 = arith.constant 0 : index
    %c0_77 = arith.constant 0 : index
    %104 = vector.load %arg9[%c2_75, %c0_76, %c0_77] : memref<4x8x1xf32, #tpu.memory_space<vmem>>, vector<1x8x1xf32>
    %105 = vector.shape_cast %104 : vector<1x8x1xf32> to vector<8x1xf32>
    %106 = vector.shape_cast %103 : vector<8x1xf32> to vector<1x8x1xf32>
    tpu.vector_store %arg9[%c2_75, %c0_76, %c0_77], %106 {strides = array<i32>} : memref<4x8x1xf32, #tpu.memory_space<vmem>>, vector<1x8x1xf32>,
    %c2_78 = arith.constant 2 : index
    %c0_79 = arith.constant 0 : index
    %c0_80 = arith.constant 0 : index
    %107 = vector.load %arg10[%c2_78, %c0_79, %c0_80] : memref<4x8x8xf32, #tpu.memory_space<vmem>>, vector<1x8x8xf32>
    %108 = vector.shape_cast %107 : vector<1x8x8xf32> to vector<8x8xf32>
    %109 = vector.broadcast %94 : vector<8x1xf32> to vector<8x8xf32>
    %110 = arith.mulf %109, %108 : vector<8x8xf32>
    %111 = arith.truncf %97 : vector<8x8xf32> to vector<8x8xbf16>
    %cst_81 = arith.constant dense<0.000000e+00> : vector<8x8xf32>
    %112 = tpu.matmul %111, %86, %cst_81 {dimension_numbers = #tpu.dot_dimension_numbers<[1], [0], [0], [1], [0, 0, 1, 1], [], []>} : vector<8x8xbf16>, vector<8x8xbf16>, vector<8x8xf32> -> vector<8x8xf32>
    %113 = arith.addf %110, %112 : vector<8x8xf32>
    %c2_82 = arith.constant 2 : index
    %c0_83 = arith.constant 0 : index
    %c0_84 = arith.constant 0 : index
    %114 = vector.load %arg10[%c2_82, %c0_83, %c0_84] : memref<4x8x8xf32, #tpu.memory_space<vmem>>, vector<1x8x8xf32>
    %115 = vector.shape_cast %114 : vector<1x8x8xf32> to vector<8x8xf32>
    %116 = vector.shape_cast %113 : vector<8x8xf32> to vector<1x8x8xf32>
    tpu.vector_store %arg10[%c2_82, %c0_83, %c0_84], %116 {strides = array<i32>} : memref<4x8x8xf32, #tpu.memory_space<vmem>>, vector<1x8x8xf32>,
    %c2_85 = arith.constant 2 : index
    %c0_86 = arith.constant 0 : index
    %c0_87 = arith.constant 0 : index
    %117 = vector.load %arg8[%c2_85, %c0_86, %c0_87] : memref<4x8x1xf32, #tpu.memory_space<vmem>>, vector<1x8x1xf32>
    %118 = vector.shape_cast %117 : vector<1x8x1xf32> to vector<8x1xf32>
    %119 = vector.shape_cast %92 : vector<8x1xf32> to vector<1x8x1xf32>
    tpu.vector_store %arg8[%c2_85, %c0_86, %c0_87], %119 {strides = array<i32>} : memref<4x8x1xf32, #tpu.memory_space<vmem>>, vector<1x8x1xf32>,
    %c0_88 = arith.constant 0 : index
    %c0_89 = arith.constant 0 : index
    %c24 = arith.constant 24 : index
    %120 = vector.load %arg4[%c0_88, %c0_89, %c24] : memref<1x8x32xbf16, #tpu.memory_space<vmem>>, vector<1x8x8xbf16>
    %121 = vector.shape_cast %120 : vector<1x8x8xbf16> to vector<8x8xbf16>
    %c0_90 = arith.constant 0 : index
    %c0_91 = arith.constant 0 : index
    %c24_92 = arith.constant 24 : index
    %122 = vector.load %arg5[%c0_90, %c0_91, %c24_92] : memref<1x8x32xbf16, #tpu.memory_space<vmem>>, vector<1x8x8xbf16>
    %123 = vector.shape_cast %122 : vector<1x8x8xbf16> to vector<8x8xbf16>
    %c0_93 = arith.constant 0 : index
    %c0_94 = arith.constant 0 : index
    %c24_95 = arith.constant 24 : index
    %124 = vector.load %arg6[%c0_93, %c0_94, %c24_95] : memref<1x8x32xbf16, #tpu.memory_space<vmem>>, vector<1x8x8xbf16>
    %125 = vector.shape_cast %124 : vector<1x8x8xbf16> to vector<8x8xbf16>
    %cst_96 = arith.constant dense<0.000000e+00> : vector<8x8xf32>
    %126 = tpu.matmul %121, %123, %cst_96 {dimension_numbers = #tpu.dot_dimension_numbers<[1], [1], [0], [0], [0, 0, 1, 0], [], []>} : vector<8x8xbf16>, vector<8x8xbf16>, vector<8x8xf32> -> vector<8x8xf32>
    %c3 = arith.constant 3 : index
    %c0_97 = arith.constant 0 : index
    %c0_98 = arith.constant 0 : index
    %127 = vector.load %arg8[%c3, %c0_97, %c0_98] : memref<4x8x1xf32, #tpu.memory_space<vmem>>, vector<1x8x1xf32>
    %128 = vector.shape_cast %127 : vector<1x8x1xf32> to vector<8x1xf32>
    %cst_99 = arith.constant dense<0xFF800000> : vector<8xf32>
    %129 = vector.multi_reduction <maximumf>, %126, %cst_99 [1] : vector<8x8xf32> to vector<8xf32>
    %130 = vector.shape_cast %129 : vector<8xf32> to vector<8x1xf32>
    %131 = arith.maximumf %128, %130 : vector<8x1xf32>
    %132 = arith.subf %128, %131 : vector<8x1xf32>
    %133 = math.exp %132 : vector<8x1xf32>
    %134 = vector.broadcast %131 : vector<8x1xf32> to vector<8x8xf32>
    %135 = arith.subf %126, %134 : vector<8x8xf32>
    %136 = math.exp %135 : vector<8x8xf32>
    %c3_100 = arith.constant 3 : index
    %c0_101 = arith.constant 0 : index
    %c0_102 = arith.constant 0 : index
    %137 = vector.load %arg9[%c3_100, %c0_101, %c0_102] : memref<4x8x1xf32, #tpu.memory_space<vmem>>, vector<1x8x1xf32>
    %138 = vector.shape_cast %137 : vector<1x8x1xf32> to vector<8x1xf32>
    %139 = arith.mulf %133, %138 : vector<8x1xf32>
    %cst_103 = arith.constant dense<0.000000e+00> : vector<8xf32>
    %140 = vector.multi_reduction <add>, %136, %cst_103 [1] : vector<8x8xf32> to vector<8xf32>
    %141 = vector.shape_cast %140 : vector<8xf32> to vector<8x1xf32>
    %142 = arith.addf %139, %141 : vector<8x1xf32>
    %c3_104 = arith.constant 3 : index
    %c0_105 = arith.constant 0 : index
    %c0_106 = arith.constant 0 : index
    %143 = vector.load %arg9[%c3_104, %c0_105, %c0_106] : memref<4x8x1xf32, #tpu.memory_space<vmem>>, vector<1x8x1xf32>
    %144 = vector.shape_cast %143 : vector<1x8x1xf32> to vector<8x1xf32>
    %145 = vector.shape_cast %142 : vector<8x1xf32> to vector<1x8x1xf32>
    tpu.vector_store %arg9[%c3_104, %c0_105, %c0_106], %145 {strides = array<i32>} : memref<4x8x1xf32, #tpu.memory_space<vmem>>, vector<1x8x1xf32>,
    %c3_107 = arith.constant 3 : index
    %c0_108 = arith.constant 0 : index
    %c0_109 = arith.constant 0 : index
    %146 = vector.load %arg10[%c3_107, %c0_108, %c0_109] : memref<4x8x8xf32, #tpu.memory_space<vmem>>, vector<1x8x8xf32>
    %147 = vector.shape_cast %146 : vector<1x8x8xf32> to vector<8x8xf32>
    %148 = vector.broadcast %133 : vector<8x1xf32> to vector<8x8xf32>
    %149 = arith.mulf %148, %147 : vector<8x8xf32>
    %150 = arith.truncf %136 : vector<8x8xf32> to vector<8x8xbf16>
    %cst_110 = arith.constant dense<0.000000e+00> : vector<8x8xf32>
    %151 = tpu.matmul %150, %125, %cst_110 {dimension_numbers = #tpu.dot_dimension_numbers<[1], [0], [0], [1], [0, 0, 1, 1], [], []>} : vector<8x8xbf16>, vector<8x8xbf16>, vector<8x8xf32> -> vector<8x8xf32>
    %152 = arith.addf %149, %151 : vector<8x8xf32>
    %c3_111 = arith.constant 3 : index
    %c0_112 = arith.constant 0 : index
    %c0_113 = arith.constant 0 : index
    %153 = vector.load %arg10[%c3_111, %c0_112, %c0_113] : memref<4x8x8xf32, #tpu.memory_space<vmem>>, vector<1x8x8xf32>
    %154 = vector.shape_cast %153 : vector<1x8x8xf32> to vector<8x8xf32>
    %155 = vector.shape_cast %152 : vector<8x8xf32> to vector<1x8x8xf32>
    tpu.vector_store %arg10[%c3_111, %c0_112, %c0_113], %155 {strides = array<i32>} : memref<4x8x8xf32, #tpu.memory_space<vmem>>, vector<1x8x8xf32>,
    %c3_114 = arith.constant 3 : index
    %c0_115 = arith.constant 0 : index
    %c0_116 = arith.constant 0 : index
    %156 = vector.load %arg8[%c3_114, %c0_115, %c0_116] : memref<4x8x1xf32, #tpu.memory_space<vmem>>, vector<1x8x1xf32>
    %157 = vector.shape_cast %156 : vector<1x8x1xf32> to vector<8x1xf32>
    %158 = vector.shape_cast %131 : vector<8x1xf32> to vector<1x8x1xf32>
    tpu.vector_store %arg8[%c3_114, %c0_115, %c0_116], %158 {strides = array<i32>} : memref<4x8x1xf32, #tpu.memory_space<vmem>>, vector<1x8x1xf32>,
    %c0_i32_117 = arith.constant 0 : i32
    %159 = arith.cmpi eq, %arg3, %c0_i32_117 : i32
    %160 = arith.extui %159 : i1 to i32
    %c0_i32_118 = arith.constant 0 : i32
    %161 = arith.cmpi ne, %160, %c0_i32_118 : i32
    scf.if %161 {
      %c0_119 = arith.constant 0 : index
      %c0_120 = arith.constant 0 : index
      %c0_121 = arith.constant 0 : index
      %162 = vector.load %arg9[%c0_119, %c0_120, %c0_121] : memref<4x8x1xf32, #tpu.memory_space<vmem>>, vector<1x8x1xf32>
      %163 = vector.shape_cast %162 : vector<1x8x1xf32> to vector<8x1xf32>
      %164 = tpu.reciprocal %163 {approx = true} : vector<8x1xf32> -> vector<8x1xf32>
      %c0_122 = arith.constant 0 : index
      %c0_123 = arith.constant 0 : index
      %c0_124 = arith.constant 0 : index
      %165 = vector.load %arg10[%c0_122, %c0_123, %c0_124] : memref<4x8x8xf32, #tpu.memory_space<vmem>>, vector<1x8x8xf32>
      %166 = vector.shape_cast %165 : vector<1x8x8xf32> to vector<8x8xf32>
      %167 = vector.broadcast %164 : vector<8x1xf32> to vector<8x8xf32>
      %168 = arith.mulf %166, %167 : vector<8x8xf32>
      %169 = arith.truncf %168 : vector<8x8xf32> to vector<8x8xbf16>
      %c0_125 = arith.constant 0 : index
      %c0_126 = arith.constant 0 : index
      %c0_127 = arith.constant 0 : index
      %170 = vector.load %arg7[%c0_125, %c0_126, %c0_127] : memref<1x8x32xbf16, #tpu.memory_space<vmem>>, vector<1x8x8xbf16>
      %171 = vector.shape_cast %170 : vector<1x8x8xbf16> to vector<8x8xbf16>
      %172 = vector.shape_cast %169 : vector<8x8xbf16> to vector<1x8x8xbf16>
      tpu.vector_store %arg7[%c0_125, %c0_126, %c0_127], %172 {strides = array<i32>} : memref<1x8x32xbf16, #tpu.memory_space<vmem>>, vector<1x8x8xbf16>,
      %c1_128 = arith.constant 1 : index
      %c0_129 = arith.constant 0 : index
      %c0_130 = arith.constant 0 : index
      %173 = vector.load %arg9[%c1_128, %c0_129, %c0_130] : memref<4x8x1xf32, #tpu.memory_space<vmem>>, vector<1x8x1xf32>
      %174 = vector.shape_cast %173 : vector<1x8x1xf32> to vector<8x1xf32>
      %175 = tpu.reciprocal %174 {approx = true} : vector<8x1xf32> -> vector<8x1xf32>
      %c1_131 = arith.constant 1 : index
      %c0_132 = arith.constant 0 : index
      %c0_133 = arith.constant 0 : index
      %176 = vector.load %arg10[%c1_131, %c0_132, %c0_133] : memref<4x8x8xf32, #tpu.memory_space<vmem>>, vector<1x8x8xf32>
      %177 = vector.shape_cast %176 : vector<1x8x8xf32> to vector<8x8xf32>
      %178 = vector.broadcast %175 : vector<8x1xf32> to vector<8x8xf32>
      %179 = arith.mulf %177, %178 : vector<8x8xf32>
      %180 = arith.truncf %179 : vector<8x8xf32> to vector<8x8xbf16>
      %c0_134 = arith.constant 0 : index
      %c0_135 = arith.constant 0 : index
      %c8_136 = arith.constant 8 : index
      %181 = vector.load %arg7[%c0_134, %c0_135, %c8_136] : memref<1x8x32xbf16, #tpu.memory_space<vmem>>, vector<1x8x8xbf16>
      %182 = vector.shape_cast %181 : vector<1x8x8xbf16> to vector<8x8xbf16>
      %183 = vector.shape_cast %180 : vector<8x8xbf16> to vector<1x8x8xbf16>
      tpu.vector_store %arg7[%c0_134, %c0_135, %c8_136], %183 {strides = array<i32>} : memref<1x8x32xbf16, #tpu.memory_space<vmem>>, vector<1x8x8xbf16>,
      %c2_137 = arith.constant 2 : index
      %c0_138 = arith.constant 0 : index
      %c0_139 = arith.constant 0 : index
      %184 = vector.load %arg9[%c2_137, %c0_138, %c0_139] : memref<4x8x1xf32, #tpu.memory_space<vmem>>, vector<1x8x1xf32>
      %185 = vector.shape_cast %184 : vector<1x8x1xf32> to vector<8x1xf32>
      %186 = tpu.reciprocal %185 {approx = true} : vector<8x1xf32> -> vector<8x1xf32>
      %c2_140 = arith.constant 2 : index
      %c0_141 = arith.constant 0 : index
      %c0_142 = arith.constant 0 : index
      %187 = vector.load %arg10[%c2_140, %c0_141, %c0_142] : memref<4x8x8xf32, #tpu.memory_space<vmem>>, vector<1x8x8xf32>
      %188 = vector.shape_cast %187 : vector<1x8x8xf32> to vector<8x8xf32>
      %189 = vector.broadcast %186 : vector<8x1xf32> to vector<8x8xf32>
      %190 = arith.mulf %188, %189 : vector<8x8xf32>
      %191 = arith.truncf %190 : vector<8x8xf32> to vector<8x8xbf16>
      %c0_143 = arith.constant 0 : index
      %c0_144 = arith.constant 0 : index
      %c16_145 = arith.constant 16 : index
      %192 = vector.load %arg7[%c0_143, %c0_144, %c16_145] : memref<1x8x32xbf16, #tpu.memory_space<vmem>>, vector<1x8x8xbf16>
      %193 = vector.shape_cast %192 : vector<1x8x8xbf16> to vector<8x8xbf16>
      %194 = vector.shape_cast %191 : vector<8x8xbf16> to vector<1x8x8xbf16>
      tpu.vector_store %arg7[%c0_143, %c0_144, %c16_145], %194 {strides = array<i32>} : memref<1x8x32xbf16, #tpu.memory_space<vmem>>, vector<1x8x8xbf16>,
      %c3_146 = arith.constant 3 : index
      %c0_147 = arith.constant 0 : index
      %c0_148 = arith.constant 0 : index
      %195 = vector.load %arg9[%c3_146, %c0_147, %c0_148] : memref<4x8x1xf32, #tpu.memory_space<vmem>>, vector<1x8x1xf32>
      %196 = vector.shape_cast %195 : vector<1x8x1xf32> to vector<8x1xf32>
      %197 = tpu.reciprocal %196 {approx = true} : vector<8x1xf32> -> vector<8x1xf32>
      %c3_149 = arith.constant 3 : index
      %c0_150 = arith.constant 0 : index
      %c0_151 = arith.constant 0 : index
      %198 = vector.load %arg10[%c3_149, %c0_150, %c0_151] : memref<4x8x8xf32, #tpu.memory_space<vmem>>, vector<1x8x8xf32>
      %199 = vector.shape_cast %198 : vector<1x8x8xf32> to vector<8x8xf32>
      %200 = vector.broadcast %197 : vector<8x1xf32> to vector<8x8xf32>
      %201 = arith.mulf %199, %200 : vector<8x8xf32>
      %202 = arith.truncf %201 : vector<8x8xf32> to vector<8x8xbf16>
      %c0_152 = arith.constant 0 : index
      %c0_153 = arith.constant 0 : index
      %c24_154 = arith.constant 24 : index
      %203 = vector.load %arg7[%c0_152, %c0_153, %c24_154] : memref<1x8x32xbf16, #tpu.memory_space<vmem>>, vector<1x8x8xbf16>
      %204 = vector.shape_cast %203 : vector<1x8x8xbf16> to vector<8x8xbf16>
      %205 = vector.shape_cast %202 : vector<8x8xbf16> to vector<1x8x8xbf16>
      tpu.vector_store %arg7[%c0_152, %c0_153, %c24_154], %205 {strides = array<i32>} : memref<1x8x32xbf16, #tpu.memory_space<vmem>>, vector<1x8x8xbf16>,
    } else {
    }
    return
  }
  func.func @transform_0(%arg0: i32, %arg1: i32, %arg2: i32, %arg3: i32) -> (i32, i32, i32) {
    %c0_i32 = arith.constant 0 : i32
    %0 = arith.addi %c0_i32, %arg1 : i32
    %c0_i32_0 = arith.constant 0 : i32
    return %arg0, %arg2, %0 : i32, i32, i32
  }
  func.func @transform_1(%arg0: i32, %arg1: i32, %arg2: i32, %arg3: i32) -> (i32, i32, i32) {
    %c0_i32 = arith.constant 0 : i32
    %0 = arith.addi %c0_i32, %arg1 : i32
    %c0_i32_0 = arith.constant 0 : i32
    return %arg0, %arg3, %0 : i32, i32, i32
  }
  func.func @transform_2(%arg0: i32, %arg1: i32, %arg2: i32, %arg3: i32) -> (i32, i32, i32) {
    %c0_i32 = arith.constant 0 : i32
    %0 = arith.addi %c0_i32, %arg1 : i32
    %c0_i32_0 = arith.constant 0 : i32
    return %arg0, %arg3, %0 : i32, i32, i32
  }
  func.func @transform_3(%arg0: i32, %arg1: i32, %arg2: i32, %arg3: i32) -> (i32, i32, i32) {
    %c0_i32 = arith.constant 0 : i32
    return %arg0, %arg2, %arg1 : i32, i32, i32
  }
}

</mosaic_0001>

<bundles_post_ra>
// kernel: multi_head_attention.5
= control target key start
LH: loop header
LB: loop body
LE: loop exit
PB: predicated region body
PF: predicated region fallthrough
CT: control target
= control target key end

     0   :  { %v210_v0 = vmov 0.0   ;;  %vm211_vm0 = vmmov 0   ;;  %s268_s1 = inlined_call_operand.vmem [shape: bf16[128,128], index: 1, kind: input, shape index: {}]   ;;  %s269_s0 = inlined_call_operand.vmem [shape: bf16[16,128], index: 0, kind: input, shape index: {}]   ;;  %s270_s2 = inlined_call_operand.vmem [shape: f32[1,128], index: 2, kind: input, shape index: {}]   ;;  %s271_s3 = inlined_call_operand.vmem [shape: f32[16,128], index: 3, kind: output, shape index: {}]  }
   0x1   :  { %179 = vmatprep.subr.bf16.mxu0 %v210_v0  ;;  %v201_v1 = vld [vmem:[%s268_s1] sm:$0xff]   ;;  %195 = vmatprep.mubr.msk.bf16.mxu0 %vm211_vm0, %v210_v0  ;;  %v202_v2 = vld [vmem:[%s268_s1 + $0x8] sm:$0xff]   ;;  %v203_v3 = vld [vmem:[%s268_s1 + $0x10] sm:$0xff]  }
   0x2   :  { %180 = vmatpush3.bf16.msra.mxu0 %v201_v1  ;;  %v204_v4 = vld [vmem:[%s268_s1 + $0x18] sm:$0xff]   ;;  %v205_v5 = vld [vmem:[%s268_s1 + $0x20] sm:$0xff]   ;;  %v206_v6 = vld [vmem:[%s268_s1 + $0x28] sm:$0xff]  }
   0x3   :  { %181 = vmatprep.subr.bf16.mxu0 %v210_v0  ;;  %v207_v7 = vld [vmem:[%s268_s1 + $0x30] sm:$0xff]   ;;  %v208_v8 = vld [vmem:[%s268_s1 + $0x38] sm:$0xff]   ;;  %v209_v9 = vld [vmem:[%s269_s0] sm:$0xff]  }
   0x4   :  { %v169_v10 = vld [vmem:[%s270_s2] ss:$0 sm:$0xff] }
   0x6   :  { %182 = vmatpush3.bf16.msra.mxu0 %v202_v2 }
   0x7   :  { %183 = vmatprep.subr.bf16.mxu0 %v210_v0 }
   0xa   :  { %184 = vmatpush3.bf16.msra.mxu0 %v203_v3 }
   0xb   :  { %185 = vmatprep.subr.bf16.mxu0 %v210_v0 }
   0xe   :  { %186 = vmatpush3.bf16.msra.mxu0 %v204_v4 }
   0xf   :  { %187 = vmatprep.subr.bf16.mxu0 %v210_v0 }
  0x12   :  { %188 = vmatpush3.bf16.msra.mxu0 %v205_v5 }
  0x13   :  { %189 = vmatprep.subr.bf16.mxu0 %v210_v0 }
  0x16   :  { %190 = vmatpush3.bf16.msra.mxu0 %v206_v6 }
  0x17   :  { %191 = vmatprep.subr.bf16.mxu0 %v210_v0 }
  0x1a   :  { %192 = vmatpush3.bf16.msra.mxu0 %v207_v7 }
  0x1b   :  { %193 = vmatprep.subr.bf16.mxu0 %v210_v0 }
  0x1e   :  { %194 = vmatpush3.bf16.msra.mxu0 %v208_v8 }
  0x21   :  { %196 = vmatmul.mubr.bf16.vlgmr.msra.gmra.mrb[0].mxu0 %v209_v9 }
  0xf4   :  { %v129_v11 = vpop.f32.mrb[0].mxu0 }
  0xf5   :  { %v152_v12 = vadd.f32 %v169_v10, %v129_v11  ;;  %v197_v13 = vpop.f32.mrb[1].mxu0 }
  0xf6   :  { %v132_v14 = vpop.f32.mrb[2].mxu0 }
  0xf7   :  { %154 = vst [vmem:[%s271_s3] sm:$0xff] %v152_v12  ;;  %v153_v15 = vadd.f32 %v169_v10, %v132_v14  ;;  %v198_v16 = vpop.f32.mrb[3].mxu0 }
  0xf9   :  { %155 = vst [vmem:[%s271_s3 + $0x8] sm:$0xff] %v153_v15 }

// kernel: multi_head_attention.3
= control target key start
LH: loop header
LB: loop body
LE: loop exit
PB: predicated region body
PF: predicated region fallthrough
CT: control target
= control target key end

     0   :  { %v227_v0 = vmov 0.0   ;;  %vm228_vm0 = vmmov 0   ;;  %s282_s1 = inlined_call_operand.vmem [shape: bf16[128,128], index: 1, kind: input, shape index: {}]   ;;  %s283_s0 = inlined_call_operand.vmem [shape: bf16[16,128], index: 0, kind: input, shape index: {}]   ;;  %s284_s2 = inlined_call_operand.vmem [shape: f32[1,128], index: 2, kind: input, shape index: {}]   ;;  %s285_s3 = inlined_call_operand.vmem [shape: bf16[16,128], index: 3, kind: output, shape index: {}]  }
   0x1   :  { %196 = vmatprep.subr.bf16.mxu0 %v227_v0  ;;  %v218_v1 = vld [vmem:[%s282_s1] sm:$0xff]   ;;  %212 = vmatprep.mubr.msk.bf16.mxu0 %vm228_vm0, %v227_v0  ;;  %v219_v2 = vld [vmem:[%s282_s1 + $0x8] sm:$0xff]   ;;  %v220_v3 = vld [vmem:[%s282_s1 + $0x10] sm:$0xff]  }
   0x2   :  { %197 = vmatpush3.bf16.msra.mxu0 %v218_v1  ;;  %v221_v4 = vld [vmem:[%s282_s1 + $0x18] sm:$0xff]   ;;  %v222_v5 = vld [vmem:[%s282_s1 + $0x20] sm:$0xff]   ;;  %v223_v6 = vld [vmem:[%s282_s1 + $0x28] sm:$0xff]  }
   0x3   :  { %198 = vmatprep.subr.bf16.mxu0 %v227_v0  ;;  %v224_v7 = vld [vmem:[%s282_s1 + $0x30] sm:$0xff]   ;;  %v225_v8 = vld [vmem:[%s282_s1 + $0x38] sm:$0xff]   ;;  %v226_v9 = vld [vmem:[%s283_s0] sm:$0xff]  }
   0x4   :  { %v177_v11 = vld [vmem:[%s284_s2] ss:$0 sm:$0xff] }
   0x6   :  { %199 = vmatpush3.bf16.msra.mxu0 %v219_v2 }
   0x7   :  { %200 = vmatprep.subr.bf16.mxu0 %v227_v0 }
   0xa   :  { %201 = vmatpush3.bf16.msra.mxu0 %v220_v3 }
   0xb   :  { %202 = vmatprep.subr.bf16.mxu0 %v227_v0 }
   0xe   :  { %203 = vmatpush3.bf16.msra.mxu0 %v221_v4 }
   0xf   :  { %204 = vmatprep.subr.bf16.mxu0 %v227_v0 }
  0x12   :  { %205 = vmatpush3.bf16.msra.mxu0 %v222_v5 }
  0x13   :  { %206 = vmatprep.subr.bf16.mxu0 %v227_v0 }
  0x16   :  { %207 = vmatpush3.bf16.msra.mxu0 %v223_v6 }
  0x17   :  { %208 = vmatprep.subr.bf16.mxu0 %v227_v0 }
  0x1a   :  { %209 = vmatpush3.bf16.msra.mxu0 %v224_v7 }
  0x1b   :  { %210 = vmatprep.subr.bf16.mxu0 %v227_v0 }
  0x1e   :  { %211 = vmatpush3.bf16.msra.mxu0 %v225_v8 }
  0x21   :  { %213 = vmatmul.mubr.bf16.vlgmr.msra.gmra.mrb[0].mxu0 %v226_v9 }
  0xf4   :  { %v129_v10 = vpop.f32.mrb[0].mxu0 }
  0xf5   :  { %v214_v12 = vpop.f32.mrb[1].mxu0  ;;  %v152_v14 = vadd.f32 %v177_v11, %v129_v10 }
  0xf6   :  { %v132_v13 = vpop.f32.mrb[2].mxu0 }
  0xf7   :  { %v153_v15 = vadd.f32 %v177_v11, %v132_v13  ;;  %v215_v16 = vpop.f32.mrb[3].mxu0 }
  0xf9   :  { %v185_v17 = vpack.c.bf16 %v153_v15, %v152_v14 }
  0xfb   :  { %186 = vst [vmem:[%s285_s3] sm:$0xff] %v185_v17  }

// kernel: multi_head_attention.4
= control target key start
LH: loop header
LB: loop body
LE: loop exit
PB: predicated region body
PF: predicated region fallthrough
CT: control target
= control target key end

     0   :  { %s1319_s12 = smov 0   ;;  %s1321_s13 = smov 0   ;;  %s1510_s0 = inlined_call_operand.vmem [shape: bf16[2,8,32], index: 0, kind: input, shape index: {}]   ;;  %s1511_s1 = inlined_call_operand.vmem [shape: bf16[2,8,32], index: 1, kind: input, shape index: {}]   ;;  %s1512_s2 = inlined_call_operand.vmem [shape: bf16[2,8,32], index: 2, kind: input, shape index: {}]   ;;  %s1513_s3 = inlined_call_operand.vmem [shape: bf16[2,8,32], index: 3, kind: output, shape index: {}]  }
   0x1   :  { %s1323_s14 = smov 0  }
   0x2 LB: > { %s39_s15 = sadd.s32 1, %s1283_s13  ;;  %p1102_p0 = scmp.ge.s32.totalorder %s1287_s14, 1  ;;  %s1287_s14 = sphi %s1323_s14, %s13_s14   ;;  %s1283_s13 = sphi %s1321_s13, %s1515_s13   ;;  %s1279_s12 = sphi %s1319_s12, %s1514_s12  }
   0x3   : > { %p41_p1 = scmp.ge.s32.totalorder %s39_s15, 2  ;;  %p214_p2 = scmp.lt.s32.totalorder %s1287_s14, 3 }
   0x5   : > { %s1517_s15 = smov (%p41_p1, %s39_s15), 0  ;;  %p215_p3 = pnand %p1102_p0, %p214_p2 }
   0x6   : > { %p268_p4 = scmp.lt.s32.totalorder (!%p215_p3), %s1279_s12, 1  ;;  %vm322_vm0 = vcmask (!%p215_p3), 64512   ;;  %v1289_v0 = vmov (!%p215_p3), 0.0   ;;  %vm1290_vm1 = vmmov (!%p215_p3), 0   ;;  %vm313_vm2 = vcmask (!%p215_p3), 7168   ;;  %s1293_s23 = smov (!%p215_p3), 120  }
   0x7   : > { %218 = sbr.rel (%p215_p3) target bundleno = 1464 (0x5b8), region = 32  ;;  %1148 = vmatprep.subr.bf16.mxu0 (!%p215_p3), %v1289_v0  ;;  %323 = vst.msk [vmem:[#allocation4] sm:$0xff] (!%p215_p3), %vm322_vm0, %v1289_v0  ;;  %324 = vst.msk [vmem:[#allocation4 + $0x8] sm:$0xff] (!%p215_p3), %vm322_vm0, %v1289_v0  ;;  %1150 = vmatprep.mubr.msk.bf16.mxu0 (!%p215_p3), %vm1290_vm1, %v1289_v0  ;;  %v1291_v4 = vmov (!%p215_p3), -inf   ;;  %v1292_v10 = vmov (!%p215_p3), 0   ;;  %s1294_s24 = smov (!%p215_p3), 112  }
   0x8   : > { %325 = vst.msk [vmem:[#allocation4 + $0x10] sm:$0xff] (!%p215_p3), %vm322_vm0, %v1289_v0  ;;  %326 = vst.msk [vmem:[#allocation4 + $0x18] sm:$0xff] (!%p215_p3), %vm322_vm0, %v1289_v0  ;;  %1154 = vmatprep.subr.bf16.mxu1 (!%p215_p3), %v1289_v0  ;;  %1156 = vmatprep.mubr.msk.bf16.mxu1 (!%p215_p3), %vm1290_vm1, %v1289_v0  ;;  %s1295_s25 = smov (!%p215_p3), 104   ;;  %vm412_vm3 = vcmask (!%p215_p3), 1043456   ;;  %vm913_vm4 = vcmask (!%p215_p3), 60416   ;;  %s1296_s5 = smov (!%p215_p3), 8  }
   0x9   : > { %314 = vst.msk [vmem:[#allocation2] sm:$0xff] (!%p215_p3), %vm313_vm2, %v1291_v4  ;;  %315 = vst.msk [vmem:[#allocation2 + $0x8] sm:$0xff] (!%p215_p3), %vm313_vm2, %v1291_v4  ;;  %1230 = vset.pattern.permute.xlu0 (!%p215_p3), %v1292_v10  ;;  %1231 = vset.pattern.permute.xlu1 (!%p215_p3), %v1292_v10  ;;  %s1297_s6 = smov (!%p215_p3), 16   ;;  %s1298_s7 = smov (!%p215_p3), 24   ;;  %vm931_vm5 = vcmask (!%p215_p3), 126016   ;;  %vm949_vm6 = vcmask (!%p215_p3), 191616  }
   0xa   : > { %316 = vst.msk [vmem:[#allocation2 + $0x10] sm:$0xff] (!%p215_p3), %vm313_vm2, %v1291_v4  ;;  %317 = vst.msk [vmem:[#allocation2 + $0x18] sm:$0xff] (!%p215_p3), %vm313_vm2, %v1291_v4  ;;  %vm967_vm7 = vcmask (!%p215_p3), 257216  }
   0xb   : > { %318 = vst.msk [vmem:[#allocation3] sm:$0xff] (!%p215_p3), %vm313_vm2, %v1289_v0  ;;  %319 = vst.msk [vmem:[#allocation3 + $0x8] sm:$0xff] (!%p215_p3), %vm313_vm2, %v1289_v0 }
   0xc   : > { %320 = vst.msk [vmem:[#allocation3 + $0x10] sm:$0xff] (!%p215_p3), %vm313_vm2, %v1289_v0  ;;  %321 = vst.msk [vmem:[#allocation3 + $0x18] sm:$0xff] (!%p215_p3), %vm313_vm2, %v1289_v0 }
   0xe   : > { %s1519_s12 = smov (!%p268_p4, %s1279_s12), 1 }
   0xf   : > { %s1351_s16 = sshll.u32 %s1519_s12, 2 }
  0x10   : > { %s1357_s19 = scalar_lea.vmem %s1511_s1, %s1351_s16  ;;  %s1364_s22 = scalar_lea.vmem %s1510_s0, %s1351_s16  ;;  %v1397_v17 = vld [vmem:[#allocation2] sm:$0xff]  ;;  %v1440_v56 = vld [vmem:[#allocation2 + $0x8] sm:$0xff] }
  0x11   : > { %v328_v1 = vld [vmem:[%s1357_s19] sm:$0xf]  ;;  %s1411_s28 = scalar_lea.vmem %s1512_s2, %s1351_s16  ;;  %v1450_v60 = vld [vmem:[#allocation2 + $0x10] sm:$0xff]  ;;  %s1492_s4 = scalar_lea.vmem %s1513_s3, %s1351_s16 }
  0x12   : > { %v335_v2 = vsel %vm322_vm0, %v328_v1, 0  ;;  %v327_v3 = vld [vmem:[%s1364_s22] sm:$0xf]  ;;  %v813_v1 = vld [vmem:[#allocation2 + $0x18] sm:$0xff] }
  0x13   : > { %1149 = vmatpush3.bf16.xpose.msra.mxu0 %v335_v2  ;;  %v1232_v11 = vld [vmem:[%s1357_s19] ss:$0 sps:$4 sm:$0xff]  }
  0x14   : > { %1166 = vmatprep.subr.bf16.mxu0 %v1289_v0  ;;  %470 = vrot.lane.b32.xlu1 %v1232_v11, %s1293_s23  ;;  %v1233_v12 = vld [vmem:[%s1364_s22] ss:$0 sps:$4 sm:$0xff]  }
  0x15   : > { %v1234_v13 = vld [vmem:[%s1357_s19] ss:$0 sps:$4 sm:$0xff]  }
  0x16   : > { %v1235_v14 = vld [vmem:[%s1364_s22] ss:$0 sps:$4 sm:$0xff]  }
  0x17   : > { %v1236_v15 = vld [vmem:[%s1357_s19] ss:$0 sps:$4 sm:$0xff]  }
  0x18   : > { %465 = vrot.lane.b32.xlu1 %v1233_v12, %s1293_s23  ;;  %v1237_v16 = vld [vmem:[%s1364_s22] ss:$0 sps:$4 sm:$0xff]  }
  0x19   : > { %v329_v21 = vld [vmem:[%s1411_s28] sm:$0xf] }
  0x1a   : > { %1151 = vmatmul.mubr.msk.bf16.vlgmr.msra.gmra.mrb[0].mxu0 %vm322_vm0, %v327_v3  ;;  %v414_v22 = vsel %vm412_vm3, %v329_v21, 0 }
  0x1b   : > { %1168 = vmatprep.mubr.msk.bf16.mxu0 %vm1290_vm1, %v1289_v0  ;;  %1155 = vmatpush3.bf16.msra.mxu1 %v414_v22 }
  0x1c   : > { %617 = vrot.lane.b32.xlu1 %v1234_v13, %s1294_s24  ;;  %1160 = vmatprep.subr.bf16.mxu1 %v1289_v0 }
  0x20   : > { %612 = vrot.lane.b32.xlu1 %v1235_v14, %s1294_s24 }
  0x24   : > { %764 = vrot.lane.b32.xlu1 %v1236_v15, %s1295_s25 }
  0x28   : > { %759 = vrot.lane.b32.xlu1 %v1237_v16, %s1295_s25 }
  0x86   : > { %v471_v26 = vpop.permute.xlu1 %470 }
  0x87   : > { %v476_v29 = vsel %vm322_vm0, %v471_v26, 0 }
  0x8a   : > { %v466_v27 = vpop.permute.xlu1 %465 }
  0x8e   : > { %v618_v31 = vpop.permute.xlu1 %617 }
  0x8f   : > { %v623_v33 = vsel %vm322_vm0, %v618_v31, 0 }
  0x92   : > { %v613_v32 = vpop.permute.xlu1 %612 }
  0x96   : > { %v765_v34 = vpop.permute.xlu1 %764 }
  0x97   : > { %v770_v35 = vsel %vm322_vm0, %v765_v34, 0 }
  0x9a   : > { %v760_v36 = vpop.permute.xlu1 %759 }
  0xed   : > { %v371_v5 = vpop.f32.mrb[0].mxu0 }
  0xee   : > { %v1152_v6 = vpop.f32.mrb[1].mxu0  ;;  %v378_v7 = vsel %vm322_vm0, %v371_v5, -inf }
  0xef   : > { %379 = vmax.xlane.f32.xlu0 %v378_v7  ;;  %v374_v8 = vpop.f32.mrb[2].mxu0  ;;  %v1239_v6 = vld [vmem:[%s1411_s28] ss:$0 sps:$4 sm:$0xff]  }
  0xf0   : > { %v1153_v9 = vpop.f32.mrb[3].mxu0  ;;  %v1240_v7 = vld [vmem:[%s1411_s28] ss:$0 sps:$4 sm:$0xff]  }
 0x17c   : > { %v380_v18 = vpop.xlane.xlu0 %379 }
 0x17d   : > { %v1400_v19 = vmax.f32 %v1397_v17, %v380_v18 }
 0x17f   : > { %v382_v20 = vsub.f32 %v1397_v17, %v1400_v19  ;;  %458 = vst.msk [vmem:[#allocation2] sm:$0xff] %vm313_vm2, %v1400_v19  ;;  %387 = vperm.xlu0 %1230, %v1400_v19  }
 0x181   : > { %v383_v34 = vmul.f32 1.442695, %v382_v20 }
 0x1fe   : > { %v388_v23 = vpop.permute.xlu0 %387 }
 0x1ff   : > { %v390_v24 = vsub.f32 %v371_v5, %v388_v23  ;;  %v1238_v5 = vld [vmem:[%s1411_s28] ss:$0 sps:$4 sm:$0xff]  }
 0x201   : > { %v391_v25 = vmul.f32 1.442695, %v390_v24 }
 0x203   : > { %1241 = vpow2.f32 %v391_v25 }
 0x20d   : > { %v1416_v28 = vpop.eup %1241 }
 0x20e   : > { %v408_v30 = vpack.c.bf16 %v1416_v28, %v1416_v28  ;;  %v395_v8 = vsel %vm322_vm0, %v1416_v28, 0.0 }
 0x210   : > { %1157 = vmatmul.mubr.msk.bf16.vlgmr.msra.gmra.mrb[0].mxu1 %vm322_vm0, %v408_v30 }
 0x211   : > { %1161 = vmatpush3.bf16.xpose.msra.mxu1 %v476_v29  ;;  %1162 = vmatprep.mubr.msk.bf16.mxu1 %vm1290_vm1, %v1289_v0 }
 0x212   : > { %1172 = vmatprep.subr.bf16.mxu1 %v1289_v0 }
 0x218   : > { %1163 = vmatmul.mubr.msk.bf16.vlgmr.msra.gmra.mrb[4].mxu1 %vm322_vm0, %v466_v27 }
 0x219   : > { %1173 = vmatpush3.bf16.xpose.msra.mxu1 %v623_v33  ;;  %1174 = vmatprep.mubr.msk.bf16.mxu1 %vm1290_vm1, %v1289_v0 }
 0x21a   : > { %1184 = vmatprep.subr.bf16.mxu1 %v1289_v0 }
 0x220   : > { %1175 = vmatmul.mubr.msk.bf16.vlgmr.msra.gmra.mrb[8].mxu1 %vm322_vm0, %v613_v32 }
 0x221   : > { %1185 = vmatpush3.bf16.xpose.msra.mxu1 %v770_v35  ;;  %1186 = vmatprep.mubr.msk.bf16.mxu1 %vm1290_vm1, %v1289_v0 }
 0x228   : > { %1187 = vmatmul.mubr.msk.bf16.vlgmr.msra.gmra.mrb[12].mxu1 %vm322_vm0, %v760_v36 }
 0x2e3   : > { %v1435_v37 = vpop.f32.mrb[0].mxu1 }
 0x2e4   : > { %v1158_v38 = vpop.f32.mrb[1].mxu1 }
 0x2e5   : > { %v453_v39 = vpop.f32.mrb[2].mxu1 }
 0x2e6   : > { %v1159_v40 = vpop.f32.mrb[3].mxu1 }
 0x2eb   : > { %v512_v41 = vpop.f32.mrb[4].mxu1 }
 0x2ec   : > { %v1164_v42 = vpop.f32.mrb[5].mxu1  ;;  %v520_v43 = vsel %vm322_vm0, %v512_v41, -inf }
 0x2ed   : > { %521 = vmax.xlane.f32.xlu1 %v520_v43  ;;  %v515_v44 = vpop.f32.mrb[6].mxu1  ;;  %v393_v42 = vld [vmem:[#allocation3] sm:$0xff] }
 0x2ee   : > { %v1165_v45 = vpop.f32.mrb[7].mxu1 }
 0x2f3   : > { %v659_v46 = vpop.f32.mrb[8].mxu1 }
 0x2f4   : > { %v1176_v47 = vpop.f32.mrb[9].mxu1  ;;  %v667_v48 = vsel %vm322_vm0, %v659_v46, -inf }
 0x2f5   : > { %668 = vmax.xlane.f32.xlu0 %v667_v48  ;;  %v662_v49 = vpop.f32.mrb[10].mxu1  ;;  %v536_v47 = vld [vmem:[#allocation3 + $0x8] sm:$0xff] }
 0x2f6   : > { %v1177_v50 = vpop.f32.mrb[11].mxu1 }
 0x2fb   : > { %v806_v51 = vpop.f32.mrb[12].mxu1 }
 0x2fc   : > { %v1188_v52 = vpop.f32.mrb[13].mxu1  ;;  %v814_v53 = vsel %vm322_vm0, %v806_v51, -inf }
 0x2fd   : > { %815 = vmax.xlane.f32.xlu1 %v814_v53  ;;  %v809_v54 = vpop.f32.mrb[14].mxu1 }
 0x2fe   : > { %v1189_v55 = vpop.f32.mrb[15].mxu1 }
 0x37a   : > { %v522_v57 = vpop.xlane.xlu1 %521 }
 0x37b   : > { %v1443_v58 = vmax.f32 %v1440_v56, %v522_v57  ;;  %v401_v57 = vld [vmem:[#allocation4] sm:$0xff] }
 0x37d   : > { %v524_v59 = vsub.f32 %v1440_v56, %v1443_v58  ;;  %605 = vst.msk [vmem:[#allocation2 + $0x8] sm:$0xff] %vm313_vm2, %v1443_v58  ;;  %529 = vperm.xlu1 %1231, %v1443_v58   ;;  %v830_v56 = vld [vmem:[#allocation3 + $0x18] sm:$0xff] }
 0x37f   : > { %v525_v36 = vmul.f32 1.442695, %v524_v59 }
 0x382   : > { %v669_v61 = vpop.xlane.xlu0 %668 }
 0x383   : > { %v670_v62 = vmax.f32 %v1450_v60, %v669_v61 }
 0x385   : > { %v671_v63 = vsub.f32 %v1450_v60, %v670_v62  ;;  %752 = vst.msk [vmem:[#allocation2 + $0x10] sm:$0xff] %vm313_vm2, %v670_v62  ;;  %676 = vperm.xlu0 %1230, %v670_v62  }
 0x387   : > { %v672_v39 = vmul.f32 1.442695, %v671_v63 }
 0x38a   : > { %v816_v2 = vpop.xlane.xlu1 %815 }
 0x38b   : > { %v817_v3 = vmax.f32 %v813_v1, %v816_v2 }
 0x38d   : > { %v818_v4 = vsub.f32 %v813_v1, %v817_v3  ;;  %899 = vst.msk [vmem:[#allocation2 + $0x18] sm:$0xff] %vm313_vm2, %v817_v3  ;;  %823 = vperm.xlu1 %1231, %v817_v3  }
 0x38f   : > { %v819_v38 = vmul.f32 1.442695, %v818_v4 }
 0x391   : > { %555 = vrot.lane.b32.xlu1 %v1238_v5, %s1293_s23 }
 0x395   : > { %702 = vrot.lane.b32.xlu1 %v1239_v6, %s1294_s24 }
 0x399   : > { %849 = vrot.lane.b32.xlu1 %v1240_v7, %s1295_s25 }
 0x3bd   : > { %396 = vadd.xlane.f32.xlu1 %v395_v8 }
 0x3fc   : > { %v530_v9 = vpop.permute.xlu1 %529 }
 0x3fd   : > { %v532_v10 = vsub.f32 %v512_v41, %v530_v9 }
 0x3ff   : > { %v533_v11 = vmul.f32 1.442695, %v532_v10 }
 0x401   : > { %1243 = vpow2.f32 %v533_v11  ;;  %v544_v11 = vld [vmem:[#allocation4 + $0x8] sm:$0xff] }
 0x404   : > { %v677_v12 = vpop.permute.xlu0 %676 }
 0x405   : > { %v679_v13 = vsub.f32 %v659_v46, %v677_v12 }
 0x407   : > { %v680_v14 = vmul.f32 1.442695, %v679_v13 }
 0x409   : > { %1245 = vpow2.f32 %v680_v14 }
 0x40b   : > { %v1244_v15 = vpop.eup %1243 }
 0x40c   : > { %v824_v16 = vpop.permute.xlu1 %823  ;;  %v538_v18 = vsel %vm322_vm0, %v1244_v15, 0.0  ;;  %v551_v26 = vpack.c.bf16 %v1244_v15, %v1244_v15 }
 0x40d   : > { %v826_v21 = vsub.f32 %v806_v51, %v824_v16  ;;  %539 = vadd.xlane.f32.xlu0 %v538_v18  ;;  %v683_v51 = vld [vmem:[#allocation3 + $0x10] sm:$0xff] }
 0x40f   : > { %v827_v22 = vmul.f32 1.442695, %v826_v21  ;;  %v691_v21 = vld [vmem:[#allocation4 + $0x10] sm:$0xff] }
 0x410   : > { %v556_v23 = vpop.permute.xlu1 %555 }
 0x411   : > { %1247 = vpow2.f32 %v827_v22  ;;  %v561_v24 = vsel %vm412_vm3, %v556_v23, 0 }
 0x412   : > { %1167 = vmatpush3.bf16.msra.mxu0 %v561_v24  ;;  %1249 = vpow2.f32 %v383_v34 }
 0x413   : > { %v1246_v25 = vpop.eup %1245  ;;  %1178 = vmatprep.subr.bf16.mxu0 %v1289_v0  ;;  %1251 = vpow2.f32 %v525_v36 }
 0x414   : > { %v685_v27 = vsel %vm322_vm0, %v1246_v25, 0.0  ;;  %v703_v28 = vpop.permute.xlu1 %702  ;;  %v698_v32 = vpack.c.bf16 %v1246_v25, %v1246_v25  ;;  %1253 = vpow2.f32 %v819_v38 }
 0x415   : > { %686 = vadd.xlane.f32.xlu0 %v685_v27  ;;  %1169 = vmatmul.mubr.msk.bf16.vlgmr.msra.gmra.mrb[4].mxu0 %vm322_vm0, %v551_v26  ;;  %v708_v29 = vsel %vm412_vm3, %v703_v28, 0  ;;  %1255 = vpow2.f32 %v672_v39  ;;  %v838_v28 = vld [vmem:[#allocation4 + $0x18] sm:$0xff] }
 0x416   : > { %1179 = vmatpush3.bf16.msra.mxu0 %v708_v29  ;;  %1180 = vmatprep.mubr.msk.bf16.mxu0 %vm1290_vm1, %v1289_v0 }
 0x417   : > { %1190 = vmatprep.subr.bf16.mxu0 %v1289_v0 }
 0x418   : > { %v850_v30 = vpop.permute.xlu1 %849 }
 0x419   : > { %v855_v33 = vsel %vm412_vm3, %v850_v30, 0 }
 0x41b   : > { %v1248_v31 = vpop.eup %1247 }
 0x41c   : > { %v832_v35 = vsel %vm322_vm0, %v1248_v31, 0.0  ;;  %v845_v40 = vpack.c.bf16 %v1248_v31, %v1248_v31  ;;  %v1250_v17 = vpop.eup %1249 }
 0x41d   : > { %1181 = vmatmul.mubr.msk.bf16.vlgmr.msra.gmra.mrb[8].mxu0 %vm322_vm0, %v698_v32  ;;  %833 = vadd.xlane.f32.xlu1 %v832_v35  ;;  %v1252_v19 = vpop.eup %1251 }
 0x41e   : > { %1191 = vmatpush3.bf16.msra.mxu0 %v855_v33  ;;  %1192 = vmatprep.mubr.msk.bf16.mxu0 %vm1290_vm1, %v1289_v0  ;;  %v1254_v20 = vpop.eup %1253  ;;  %v394_v0 = vmul.f32 %v1250_v17, %v393_v42  ;;  %v537_v48 = vmul.f32 %v1252_v19, %v536_v47 }
 0x41f   : > { %v1256_v41 = vpop.eup %1255  ;;  %v831_v58 = vmul.f32 %v1254_v20, %v830_v56 }
 0x420   : > { %v684_v52 = vmul.f32 %v1256_v41, %v683_v51 }
 0x425   : > { %1193 = vmatmul.mubr.msk.bf16.vlgmr.msra.gmra.mrb[12].mxu0 %vm322_vm0, %v845_v40 }
 0x42b   : > { %404 = vperm.xlu0 %1230, %v1250_v17  }
 0x42e   : > { %547 = vperm.xlu1 %1231, %v1252_v19  }
 0x42f   : > { %841 = vperm.xlu0 %1230, %v1254_v20  }
 0x432   : > { %694 = vperm.xlu1 %1231, %v1256_v41  }
 0x44a   : > { %v397_v43 = vpop.xlane.xlu1 %396 }
 0x44b   : > { %v398_v44 = vadd.f32 %v397_v43, %v394_v0 }
 0x44d   : > { %400 = vst.msk [vmem:[#allocation3] sm:$0xff] %vm313_vm2, %v398_v44 }
 0x454   : > { %v903_v45 = vld [vmem:[#allocation3] sm:$0xff] }
 0x455   : > { %1257 = vrcp.f32 %v903_v45 }
 0x45f   : > { %v1258_v46 = vpop.eup %1257 }
 0x460   : > { %908 = vperm.xlu1 %1231, %v1258_v46  }
 0x49a   : > { %v540_v49 = vpop.xlane.xlu0 %539 }
 0x49b   : > { %v541_v50 = vadd.f32 %v540_v49, %v537_v48 }
 0x49d   : > { %542 = vst.msk [vmem:[#allocation3 + $0x8] sm:$0xff] %vm313_vm2, %v541_v50 }
 0x4a2   : > { %v687_v53 = vpop.xlane.xlu0 %686 }
 0x4a3   : > { %v688_v54 = vadd.f32 %v687_v53, %v684_v52 }
 0x4a4   : > { %v915_v55 = vld [vmem:[#allocation3 + $0x8] sm:$0xff] }
 0x4a5   : > { %689 = vst.msk [vmem:[#allocation3 + $0x10] sm:$0xff] %vm313_vm2, %v688_v54  ;;  %1259 = vrcp.f32 %v915_v55 }
 0x4aa   : > { %v834_v59 = vpop.xlane.xlu1 %833  ;;  %v405_v60 = vpop.permute.xlu0 %404 }
 0x4ab   : > { %v835_v61 = vadd.f32 %v834_v59, %v831_v58  ;;  %v407_v62 = vmul.f32 %v405_v60, %v401_v57 }
 0x4ac   : > { %v933_v63 = vld [vmem:[#allocation3 + $0x10] sm:$0xff] }
 0x4ad   : > { %836 = vst.msk [vmem:[#allocation3 + $0x18] sm:$0xff] %vm313_vm2, %v835_v61  ;;  %v456_v1 = vadd.f32 %v1435_v37, %v407_v62  ;;  %1261 = vrcp.f32 %v933_v63 }
 0x4ae   : > { %v548_v6 = vpop.permute.xlu1 %547  ;;  %v842_v29 = vpop.permute.xlu0 %841 }
 0x4af   : > { %v1260_v2 = vpop.eup %1259  ;;  %457 = vst.msk [vmem:[#allocation4] sm:$0xff] %vm322_vm0, %v456_v1  ;;  %v550_v12 = vmul.f32 %v548_v6, %v544_v11  ;;  %v844_v30 = vmul.f32 %v842_v29, %v838_v28 }
 0x4b0   : > { %920 = vperm.xlu0 %1230, %v1260_v2  }
 0x4b2   : > { %v695_v7 = vpop.permute.xlu1 %694 }
 0x4b3   : > { %v697_v22 = vmul.f32 %v695_v7, %v691_v21 }
 0x4b4   : > { %v951_v3 = vld [vmem:[#allocation3 + $0x18] sm:$0xff] }
 0x4b5   : > { %1263 = vrcp.f32 %v951_v3 }
 0x4b6   : > { %v905_v8 = vld [vmem:[#allocation4] sm:$0xff] }
 0x4b7   : > { %v1262_v4 = vpop.eup %1261 }
 0x4b8   : > { %938 = vperm.xlu0 %1230, %v1262_v4  }
 0x4bf   : > { %v1264_v5 = vpop.eup %1263 }
 0x4c0   : > { %956 = vperm.xlu0 %1230, %v1264_v5  }
 0x4df   : > { %v909_v9 = vpop.permute.xlu1 %908 }
 0x4e0   : > { %v911_v10 = vmul.f32 %v909_v9, %v905_v8 }
 0x4e2   : > { %v912_v37 = vpack.c.bf16 %v911_v10, %v911_v10 }
 0x4e4   : > { %914 = vst.msk [vmem:[%s1492_s4] sm:$0xf] %vm913_vm4, %v912_v37 }
 0x4e8   : > { %v597_v13 = vpop.f32.mrb[4].mxu0 }
 0x4e9   : > { %v603_v14 = vadd.f32 %v597_v13, %v550_v12  ;;  %v1170_v15 = vpop.f32.mrb[5].mxu0 }
 0x4ea   : > { %v600_v16 = vpop.f32.mrb[6].mxu0 }
 0x4eb   : > { %604 = vst.msk [vmem:[#allocation4 + $0x8] sm:$0xff] %vm322_vm0, %v603_v14  ;;  %v1171_v18 = vpop.f32.mrb[7].mxu0 }
 0x4f0   : > { %v744_v23 = vpop.f32.mrb[8].mxu0 }
 0x4f1   : > { %v750_v24 = vadd.f32 %v744_v23, %v697_v22  ;;  %v1182_v25 = vpop.f32.mrb[9].mxu0 }
 0x4f2   : > { %v747_v26 = vpop.f32.mrb[10].mxu0  ;;  %v917_v38 = vld [vmem:[#allocation4 + $0x8] sm:$0xff] }
 0x4f3   : > { %751 = vst.msk [vmem:[#allocation4 + $0x10] sm:$0xff] %vm322_vm0, %v750_v24  ;;  %v1183_v27 = vpop.f32.mrb[11].mxu0 }
 0x4f8   : > { %v891_v31 = vpop.f32.mrb[12].mxu0 }
 0x4f9   : > { %v897_v32 = vadd.f32 %v891_v31, %v844_v30  ;;  %v1194_v33 = vpop.f32.mrb[13].mxu0 }
 0x4fa   : > { %v894_v34 = vpop.f32.mrb[14].mxu0  ;;  %v935_v19 = vld [vmem:[#allocation4 + $0x10] sm:$0xff] }
 0x4fb   : > { %898 = vst.msk [vmem:[#allocation4 + $0x18] sm:$0xff] %vm322_vm0, %v897_v32  ;;  %v1195_v35 = vpop.f32.mrb[15].mxu0 }
 0x502   : > { %v953_v0 = vld [vmem:[#allocation4 + $0x18] sm:$0xff] }
 0x52f   : > { %v921_v36 = vpop.permute.xlu0 %920 }
 0x530   : > { %v923_v39 = vmul.f32 %v921_v36, %v917_v38 }
 0x532   : > { %v1129_v40 = vpack.c.bf16 %v923_v39, %v923_v39 }
 0x534   : > { %928 = vrot.lane.b32.xlu1 %v1129_v40, %s1296_s5 }
 0x537   : > { %v939_v17 = vpop.permute.xlu0 %938 }
 0x538   : > { %v941_v20 = vmul.f32 %v939_v17, %v935_v19 }
 0x53a   : > { %v1130_v41 = vpack.c.bf16 %v941_v20, %v941_v20 }
 0x53c   : > { %946 = vrot.lane.b32.xlu1 %v1130_v41, %s1297_s6 }
 0x53f   : > { %v957_v42 = vpop.permute.xlu0 %956 }
 0x540   : > { %v959_v43 = vmul.f32 %v957_v42, %v953_v0 }
 0x542   : > { %v1131_v44 = vpack.c.bf16 %v959_v43, %v959_v43 }
 0x544   : > { %964 = vrot.lane.b32.xlu1 %v1131_v44, %s1298_s7 }
 0x5a6   : > { %v929_v45 = vpop.permute.xlu1 %928 }
 0x5a7   : > { %932 = vst.msk [vmem:[%s1492_s4] sm:$0xf] %vm931_vm5, %v929_v45 }
 0x5ae   : > { %v947_v46 = vpop.permute.xlu1 %946 }
 0x5af   : > { %950 = vst.msk [vmem:[%s1492_s4] sm:$0xf] %vm949_vm6, %v947_v46 }
 0x5b6   : > { %v965_v47 = vpop.permute.xlu1 %964 }
 0x5b7   : > { %968 = vst.msk [vmem:[%s1492_s4] sm:$0xf] %vm967_vm7, %v965_v47 }
 0x5b8 PF: > { %s13_s14 = sadd.s32 1, %s1287_s14   ;;  %s1514_s12 = smov %s1283_s13 }
 0x5b9   : > { %p10_p5 = scmp.ge.s32.totalorder %s13_s14, 4   ;;  %s1515_s13 = smov %s1517_s15 }
 0x5bb   :  { %12 = sbr.rel (!%p10_p5) target bundleno = 2 (0x2), region = 85 }

</bundles_post_ra>
